<compile_context>
chip_gen: v6e
topology: v6e:2x2x1
jax: 0.10.0
libtpu: 0.0.40
codegen_flags: <defaults>
</compile_context>

<pallas_src>
import jax
import jax.numpy as jnp
from jax.experimental import pallas as pl
from jax.experimental.pallas import tpu as pltpu

IN_F, HID, OUT_F = 6, 128, 2
_FUSED_MAX_N = 1024          # whole-A-on-chip path: a few MiB of VMEM on every gen


def _round_up(x, m):
    return ((x + m - 1) // m) * m


def _lane_padded_bytes(shape, dtype):
    """VMEM footprint of one buffer: last dim -> 128 lanes, 2nd-to-last -> 8 sublanes."""
    itemsize = jnp.dtype(dtype).itemsize
    dims = list(shape)
    dims[-1] = _round_up(dims[-1], 128)
    if len(dims) >= 2:
        dims[-2] = _round_up(dims[-2], 8)
    total = itemsize
    for d in dims:
        total *= d
    return total


def _vmem_limit(pipelined_bytes, resident_bytes):
    """Double-buffered pipelined blocks + resident arrays + headroom; v7x-safe cap."""
    need = 2 * pipelined_bytes + resident_bytes
    need = int(need * 1.25) + (4 << 20)
    return int(min(max(need, 16 << 20), 48 << 20))


def _resident(shape):
    """Fully-VMEM-resident BlockSpec (same all-zero block index at every grid step)."""
    nd = len(shape)
    return pl.BlockSpec(shape, lambda *_args, _nd=nd: (0,) * _nd)


# --------------------------------------------------------------------------- #
# Kernels
# --------------------------------------------------------------------------- #
def _layer1_kernel(adj_ref, x_ref, w1t_ref, b1_ref, w2t_ref, t_ref, agg_ref):
    """Row tile i, K tile k:  agg += A[i,k] @ X[k];
    last k:  t[i] = relu(agg @ W1^T + b1) @ W2^T   (h1 never leaves VMEM)."""
    k = pl.program_id(1)

    @pl.when(k == 0)
    def _init():
        agg_ref[...] = jnp.zeros_like(agg_ref)

    adj = adj_ref[...].astype(jnp.float32)   # int8 0/1 -> exact f32, one (tm, tk) tile only
    agg_ref[...] += jnp.dot(adj, x_ref[...], preferred_element_type=jnp.float32)

    @pl.when(k == pl.num_programs(1) - 1)
    def _finalize():
        h1 = jnp.dot(agg_ref[...], w1t_ref[...], preferred_element_type=jnp.float32)
        h1 = jnp.maximum(h1 + b1_ref[...], 0.0)
        t_ref[...] = jnp.dot(h1, w2t_ref[...], preferred_element_type=jnp.float32)


def _layer2_kernel(adj_ref, t_ref, b2_ref, out_ref, acc_ref):
    """Row tile i, K tile k:  acc += A[i,k] @ t[k];  last k:  out[i] = acc + b2."""
    k = pl.program_id(1)

    @pl.when(k == 0)
    def _init():
        acc_ref[...] = jnp.zeros_like(acc_ref)

    adj = adj_ref[...].astype(jnp.float32)
    acc_ref[...] += jnp.dot(adj, t_ref[...], preferred_element_type=jnp.float32)

    @pl.when(k == pl.num_programs(1) - 1)
    def _finalize():
        out_ref[...] = acc_ref[...] + b2_ref[...]


def _fused_kernel(adj_ref, x_ref, w1t_ref, b1_ref, w2t_ref, b2_ref, out_ref):
    """Small graphs: whole int8 A resident on-chip, streamed from HBM once."""
    adj = adj_ref[...].astype(jnp.float32)
    agg = jnp.dot(adj, x_ref[...], preferred_element_type=jnp.float32)
    h1 = jnp.dot(agg, w1t_ref[...], preferred_element_type=jnp.float32)
    h1 = jnp.maximum(h1 + b1_ref[...], 0.0)
    t = jnp.dot(h1, w2t_ref[...], preferred_element_type=jnp.float32)
    out_ref[...] = jnp.dot(adj, t, preferred_element_type=jnp.float32) + b2_ref[...]


# --------------------------------------------------------------------------- #
# Wrappers
# --------------------------------------------------------------------------- #
def _fused_forward(adj_i8, x, w1t, b1r, w2t, b2r, n):
    resident = (_lane_padded_bytes((n, n), jnp.int8)
                + _lane_padded_bytes((n, n), jnp.float32)        # in-kernel f32 cast of A
                + _lane_padded_bytes((n, IN_F), jnp.float32)
                + _lane_padded_bytes((n, HID), jnp.float32)      # h1 intermediate
                + 2 * _lane_padded_bytes((n, OUT_F), jnp.float32)
                + _lane_padded_bytes((IN_F, HID), jnp.float32)
                + _lane_padded_bytes((1, HID), jnp.float32)
                + _lane_padded_bytes((HID, OUT_F), jnp.float32)
                + _lane_padded_bytes((1, OUT_F), jnp.float32))
    return pl.pallas_call(
        _fused_kernel,
        out_shape=jax.ShapeDtypeStruct((n, OUT_F), jnp.float32),
        grid=(1,),
        in_specs=[_resident((n, n)),
                  _resident((n, IN_F)),
                  _resident((IN_F, HID)),
                  _resident((1, HID)),
                  _resident((HID, OUT_F)),
                  _resident((1, OUT_F))],
        out_specs=_resident((n, OUT_F)),
        compiler_params=pltpu.CompilerParams(
            dimension_semantics=("arbitrary",),
            vmem_limit_bytes=_vmem_limit(0, resident)),
        cost_estimate=pl.CostEstimate(
            flops=2 * n * n * (IN_F + OUT_F) + 2 * n * (IN_F * HID + HID * OUT_F),
            transcendentals=0,
            bytes_accessed=n * n + n * (IN_F + OUT_F) * 4
            + (IN_F * HID + HID + HID * OUT_F + OUT_F) * 4),
    )(adj_i8, x, w1t, b1r, w2t, b2r)


def _tiled_forward(adj_i8, x, w1t, b1r, w2t, b2r, n, row_tile, k_tile):
    # Tile hygiene: int8 rows pack 32 per sublane group, adjacency lane (K) dim
    # must be a multiple of 128.  Keep tk <= ~n/8 (rounded) so column padding
    # stays small and the K pipeline has depth.
    tm = max(32, min(_round_up(row_tile, 32), _round_up(n, 32)))
    tk = max(128, min(_round_up(k_tile, 128), _round_up((n + 7) // 8, 128)))
    rows = _round_up(n, tm)       # padded row extent of A / output
    cols = _round_up(n, tk)       # padded col (K) extent of A / X / t

    # Zero padding is exact: padded A entries are 0, so padded X / t rows never
    # contribute, and padded output rows are sliced off at the end.
    if (rows, cols) != (n, n):
        adj_i8 = jnp.pad(adj_i8, ((0, rows - n), (0, cols - n)))
    if cols != n:
        x = jnp.pad(x, ((0, cols - n), (0, 0)))

    grid = (rows // tm, cols // tk)
    adj_spec = pl.BlockSpec((tm, tk), lambda i, k: (i, k))
    dimsem = ("parallel", "arbitrary")

    # ---- pass 1: t = relu((A @ X) @ W1^T + b1) @ W2^T ---------------------- #
    p1_pipelined = (_lane_padded_bytes((tm, tk), jnp.int8)
                    + _lane_padded_bytes((tk, IN_F), jnp.float32)
                    + _lane_padded_bytes((tm, OUT_F), jnp.float32))
    p1_resident = (_lane_padded_bytes((IN_F, HID), jnp.float32)
                   + _lane_padded_bytes((1, HID), jnp.float32)
                   + _lane_padded_bytes((HID, OUT_F), jnp.float32)
                   + _lane_padded_bytes((tm, IN_F), jnp.float32))
    t = pl.pallas_call(
        _layer1_kernel,
        out_shape=jax.ShapeDtypeStruct((rows, OUT_F), jnp.float32),
        grid=grid,
        in_specs=[adj_spec,
                  pl.BlockSpec((tk, IN_F), lambda i, k: (k, 0)),
                  _resident((IN_F, HID)),
                  _resident((1, HID)),
                  _resident((HID, OUT_F))],
        out_specs=pl.BlockSpec((tm, OUT_F), lambda i, k: (i, 0)),
        scratch_shapes=[pltpu.VMEM((tm, IN_F), jnp.float32)],
        compiler_params=pltpu.CompilerParams(
            dimension_semantics=dimsem,
            vmem_limit_bytes=_vmem_limit(p1_pipelined, p1_resident)),
        cost_estimate=pl.CostEstimate(
            flops=2 * rows * cols * IN_F + 2 * rows * (IN_F * HID + HID * OUT_F),
            transcendentals=0,
            bytes_accessed=rows * cols
            + (rows // tm) * cols * IN_F * 4
            + rows * OUT_F * 4
            + (IN_F * HID + HID + HID * OUT_F) * 4),
    )(adj_i8, x, w1t, b1r, w2t)

    # ---- pass 2: out = A @ t + b2 ------------------------------------------ #
    if cols > rows:
        # Padded A columns are zero, so these extra t rows never contribute;
        # they only need to exist so the K-tiled reads stay in bounds.
        t = jnp.pad(t, ((0, cols - rows), (0, 0)))
    p2_pipelined = (_lane_padded_bytes((tm, tk), jnp.int8)
                    + _lane_padded_bytes((tk, OUT_F), jnp.float32)
                    + _lane_padded_bytes((tm, OUT_F), jnp.float32))
    p2_resident = (_lane_padded_bytes((1, OUT_F), jnp.float32)
                   + _lane_padded_bytes((tm, OUT_F), jnp.float32))
    out = pl.pallas_call(
        _layer2_kernel,
        out_shape=jax.ShapeDtypeStruct((rows, OUT_F), jnp.float32),
        grid=grid,
        in_specs=[adj_spec,
                  pl.BlockSpec((tk, OUT_F), lambda i, k: (k, 0)),
                  _resident((1, OUT_F))],
        out_specs=pl.BlockSpec((tm, OUT_F), lambda i, k: (i, 0)),
        scratch_shapes=[pltpu.VMEM((tm, OUT_F), jnp.float32)],
        compiler_params=pltpu.CompilerParams(
            dimension_semantics=dimsem,
            vmem_limit_bytes=_vmem_limit(p2_pipelined, p2_resident)),
        cost_estimate=pl.CostEstimate(
            flops=2 * rows * cols * OUT_F,
            transcendentals=0,
            bytes_accessed=rows * cols
            + (rows // tm) * cols * OUT_F * 4
            + rows * OUT_F * 4 + OUT_F * 4),
    )(adj_i8, t, b2r)

    return out[:n] if rows != n else out


def gcn_net_forward(adj, features, w1, b1, w2, b2, *,
                    row_tile=256, k_tile=4096, force_tiled=False):
    """adj: [N, N] 0/1 incidence (A[i, j] = 1 iff edge j -> i); features: [N, 6].
    w1: [128, 6], b1: [128], w2: [2, 128], b2: [2]  (PyTorch nn.Linear layout)."""
    n = features.shape[0]
    assert adj.shape == (n, n)

    # NOTE: int8 adjacency storage is exact only because copy_u + sum message
    # passing uses a strict 0/1 adjacency.
    # TODO(synk): if a normalized (D^-1/2 A D^-1/2) adjacency is ever passed,
    # switch the adjacency dtype to f32/bf16 instead of int8.
    adj_i8 = jnp.asarray(adj).astype(jnp.int8)
    x = jnp.asarray(features, jnp.float32)
    w1t = jnp.asarray(w1, jnp.float32).T                # [6, 128]
    w2t = jnp.asarray(w2, jnp.float32).T                # [128, 2]
    b1r = jnp.asarray(b1, jnp.float32).reshape(1, -1)   # [1, 128]
    b2r = jnp.asarray(b2, jnp.float32).reshape(1, -1)   # [1, 2]

    if not force_tiled and n <= _FUSED_MAX_N:
        return _fused_forward(adj_i8, x, w1t, b1r, w2t, b2r, n)
    return _tiled_forward(adj_i8, x, w1t, b1r, w2t, b2r, n, row_tile, k_tile)


def _reference(adj, features, w1, b1, w2, b2):
    hi = jax.lax.Precision.HIGHEST
    agg = jnp.dot(adj, features, precision=hi)
    h = jnp.maximum(jnp.dot(agg, w1.T, precision=hi) + b1, 0.0)
    return jnp.dot(jnp.dot(adj, h, precision=hi), w2.T, precision=hi) + b2


if __name__ == "__main__":
    key = jax.random.PRNGKey(0)
    k_adj, k_x, k_w1, k_b1, k_w2, k_b2 = jax.random.split(key, 6)

    N = 200   # small and deliberately not tile-aligned (exercises the padding path)
    adj = (jax.random.uniform(k_adj, (N, N)) < 0.1).astype(jnp.float32)   # 0/1 incidence
    features = jax.random.normal(k_x, (N, IN_F), dtype=jnp.float32)

    # nn.Linear(in, out): W [out, in], b [out].
    w1 = jax.random.normal(k_w1, (HID, IN_F), dtype=jnp.float32) * 0.1
    b1 = jax.random.normal(k_b1, (HID,), dtype=jnp.float32) * 0.1
    w2 = jax.random.normal(k_w2, (OUT_F, HID), dtype=jnp.float32) * 0.1
    b2 = jax.random.normal(k_b2, (OUT_F,), dtype=jnp.float32) * 0.1

    ref = _reference(adj, features, w1, b1, w2, b2)

    # Small-graph fused path: whole int8 A resident, streamed from HBM once.
    out_fused = jax.block_until_ready(gcn_net_forward(adj, features, w1, b1, w2, b2))
    assert out_fused.shape == (N, OUT_F)
    assert jnp.allclose(out_fused, ref, atol=1e-3, rtol=1e-3), "fused path mismatch"

    # Large-graph 2-D tiled path (row tiles x K tiles), forced here with small
    # tiles so the K-accumulation / padding logic is exercised (grid = (7, 2)).
    out_tiled = jax.block_until_ready(
        gcn_net_forward(adj, features, w1, b1, w2, b2,
                        row_tile=32, k_tile=128, force_tiled=True))
    assert out_tiled.shape == (N, OUT_F)
    assert jnp.allclose(out_tiled, ref, atol=1e-3, rtol=1e-3), "tiled path mismatch"

    print("KERNEL_OK")
</pallas_src>

<mosaic_0001>
module attributes {stable_mosaic.version = 11 : i64} {
  func.func @_fused_kernel(%arg0: i32, %arg1: memref<200x200xi8, #tpu.memory_space<vmem>>, %arg2: memref<200x6xf32, #tpu.memory_space<vmem>>, %arg3: memref<6x128xf32, #tpu.memory_space<vmem>>, %arg4: memref<1x128xf32, #tpu.memory_space<vmem>>, %arg5: memref<128x2xf32, #tpu.memory_space<vmem>>, %arg6: memref<1x2xf32, #tpu.memory_space<vmem>>, %arg7: memref<200x2xf32, #tpu.memory_space<vmem>>) attributes {dimension_semantics = [#tpu.dimension_semantics<arbitrary>], iteration_bounds = array<i64: 1>, scalar_prefetch = 0 : i64, scratch_operands = 0 : i64, tpu.core_type = #tpu.core_type<tc>, window_params = [{pipeline_mode = #tpu.pipeline_mode<synchronous>, transform_indices = @transform_0, window_bounds = array<i64: 200, 200>}, {pipeline_mode = #tpu.pipeline_mode<synchronous>, transform_indices = @transform_1, window_bounds = array<i64: 200, 6>}, {pipeline_mode = #tpu.pipeline_mode<synchronous>, transform_indices = @transform_2, window_bounds = array<i64: 6, 128>}, {pipeline_mode = #tpu.pipeline_mode<synchronous>, transform_indices = @transform_3, window_bounds = array<i64: 1, 128>}, {pipeline_mode = #tpu.pipeline_mode<synchronous>, transform_indices = @transform_4, window_bounds = array<i64: 128, 2>}, {pipeline_mode = #tpu.pipeline_mode<synchronous>, transform_indices = @transform_5, window_bounds = array<i64: 1, 2>}, {pipeline_mode = #tpu.pipeline_mode<synchronous>, transform_indices = @transform_6, window_bounds = array<i64: 200, 2>}]} {
    %c0 = arith.constant 0 : index
    %c0_0 = arith.constant 0 : index
    %0 = vector.load %arg1[%c0, %c0_0] : memref<200x200xi8, #tpu.memory_space<vmem>>, vector<200x200xi8>
    %1 = arith.sitofp %0 : vector<200x200xi8> to vector<200x200xf32>
    %c0_1 = arith.constant 0 : index
    %c0_2 = arith.constant 0 : index
    %2 = vector.load %arg2[%c0_1, %c0_2] : memref<200x6xf32, #tpu.memory_space<vmem>>, vector<200x6xf32>
    %cst = arith.constant dense<0.000000e+00> : vector<200x6xf32>
    %3 = tpu.matmul %1, %2, %cst {dimension_numbers = #tpu.dot_dimension_numbers<[1], [0], [0], [1], [0, 0, 1, 1], [], []>} : vector<200x200xf32>, vector<200x6xf32>, vector<200x6xf32> -> vector<200x6xf32>
    %c0_3 = arith.constant 0 : index
    %c0_4 = arith.constant 0 : index
    %4 = vector.load %arg3[%c0_3, %c0_4] : memref<6x128xf32, #tpu.memory_space<vmem>>, vector<6x128xf32>
    %cst_5 = arith.constant dense<0.000000e+00> : vector<200x128xf32>
    %5 = tpu.matmul %3, %4, %cst_5 {dimension_numbers = #tpu.dot_dimension_numbers<[1], [0], [0], [1], [0, 0, 1, 1], [], []>} : vector<200x6xf32>, vector<6x128xf32>, vector<200x128xf32> -> vector<200x128xf32>
    %c0_6 = arith.constant 0 : index
    %c0_7 = arith.constant 0 : index
    %6 = vector.load %arg4[%c0_6, %c0_7] : memref<1x128xf32, #tpu.memory_space<vmem>>, vector<1x128xf32>
    %7 = vector.broadcast %6 : vector<1x128xf32> to vector<200x128xf32>
    %8 = arith.addf %5, %7 : vector<200x128xf32>
    %cst_8 = arith.constant 0.000000e+00 : f32
    %9 = vector.broadcast %cst_8 : f32 to vector<200x128xf32>
    %10 = arith.maximumf %8, %9 : vector<200x128xf32>
    %c0_9 = arith.constant 0 : index
    %c0_10 = arith.constant 0 : index
    %11 = vector.load %arg5[%c0_9, %c0_10] : memref<128x2xf32, #tpu.memory_space<vmem>>, vector<128x2xf32>
    %cst_11 = arith.constant dense<0.000000e+00> : vector<200x2xf32>
    %12 = tpu.matmul %10, %11, %cst_11 {dimension_numbers = #tpu.dot_dimension_numbers<[1], [0], [0], [1], [0, 0, 1, 1], [], []>} : vector<200x128xf32>, vector<128x2xf32>, vector<200x2xf32> -> vector<200x2xf32>
    %cst_12 = arith.constant dense<0.000000e+00> : vector<200x2xf32>
    %13 = tpu.matmul %1, %12, %cst_12 {dimension_numbers = #tpu.dot_dimension_numbers<[1], [0], [0], [1], [0, 0, 1, 1], [], []>} : vector<200x200xf32>, vector<200x2xf32>, vector<200x2xf32> -> vector<200x2xf32>
    %c0_13 = arith.constant 0 : index
    %c0_14 = arith.constant 0 : index
    %14 = vector.load %arg6[%c0_13, %c0_14] : memref<1x2xf32, #tpu.memory_space<vmem>>, vector<1x2xf32>
    %15 = vector.broadcast %14 : vector<1x2xf32> to vector<200x2xf32>
    %16 = arith.addf %13, %15 : vector<200x2xf32>
    %c0_15 = arith.constant 0 : index
    %c0_16 = arith.constant 0 : index
    %17 = vector.load %arg7[%c0_15, %c0_16] : memref<200x2xf32, #tpu.memory_space<vmem>>, vector<200x2xf32>
    tpu.vector_store %arg7[%c0_15, %c0_16], %16 {strides = array<i32>} : memref<200x2xf32, #tpu.memory_space<vmem>>, vector<200x2xf32>,
    return
  }
  func.func @transform_0(%arg0: i32) -> (i32, i32) {
    %c0_i32 = arith.constant 0 : i32
    %c0_i32_0 = arith.constant 0 : i32
    %c0_i32_1 = arith.constant 0 : i32
    return %c0_i32, %c0_i32_0 : i32, i32
  }
  func.func @transform_1(%arg0: i32) -> (i32, i32) {
    %c0_i32 = arith.constant 0 : i32
    %c0_i32_0 = arith.constant 0 : i32
    %c0_i32_1 = arith.constant 0 : i32
    return %c0_i32, %c0_i32_0 : i32, i32
  }
  func.func @transform_2(%arg0: i32) -> (i32, i32) {
    %c0_i32 = arith.constant 0 : i32
    %c0_i32_0 = arith.constant 0 : i32
    %c0_i32_1 = arith.constant 0 : i32
    return %c0_i32, %c0_i32_0 : i32, i32
  }
  func.func @transform_3(%arg0: i32) -> (i32, i32) {
    %c0_i32 = arith.constant 0 : i32
    %c0_i32_0 = arith.constant 0 : i32
    %c0_i32_1 = arith.constant 0 : i32
    return %c0_i32, %c0_i32_0 : i32, i32
  }
  func.func @transform_4(%arg0: i32) -> (i32, i32) {
    %c0_i32 = arith.constant 0 : i32
    %c0_i32_0 = arith.constant 0 : i32
    %c0_i32_1 = arith.constant 0 : i32
    return %c0_i32, %c0_i32_0 : i32, i32
  }
  func.func @transform_5(%arg0: i32) -> (i32, i32) {
    %c0_i32 = arith.constant 0 : i32
    %c0_i32_0 = arith.constant 0 : i32
    %c0_i32_1 = arith.constant 0 : i32
    return %c0_i32, %c0_i32_0 : i32, i32
  }
  func.func @transform_6(%arg0: i32) -> (i32, i32) {
    %c0_i32 = arith.constant 0 : i32
    %c0_i32_0 = arith.constant 0 : i32
    %c0_i32_1 = arith.constant 0 : i32
    return %c0_i32, %c0_i32_0 : i32, i32
  }
}

</mosaic_0001>

<bundles_post_ra>
// kernel: tpu_custom_call.1
= control target key start
LH: loop header
LB: loop body
LE: loop exit
PB: predicated region body
PF: predicated region fallthrough
CT: control target
= control target key end

     0   :  { %v2525_v0 = vmov 0.0   ;;  %vm173_vm0 = vcmask 588800   ;;  %vm523_vm1 = vcmask 1045504   ;;  %vm1640_vm2 = vmmov 0   ;;  %s2518_s1 = inlined_call_operand.vmem [shape: f32[200,6], index: 1, kind: input, shape index: {}]   ;;  %s2519_s0 = inlined_call_operand.vmem [shape: s8[200,200], index: 0, kind: input, shape index: {}]   ;;  %s2520_s2 = inlined_call_operand.vmem [shape: f32[6,128], index: 2, kind: input, shape index: {}]   ;;  %s2521_s4 = inlined_call_operand.vmem [shape: f32[128,2], index: 4, kind: input, shape index: {}]   ;;  %s2522_s3 = inlined_call_operand.vmem [shape: f32[1,128], index: 3, kind: input, shape index: {}]   ;;  %s2523_s5 = inlined_call_operand.vmem [shape: f32[1,2], index: 5, kind: input, shape index: {}]   ;;  %s2524_s6 = inlined_call_operand.vmem [shape: f32[200,2], index: 6, kind: output, shape index: {}]  }
   0x1   :  { %249 = vmatprep.subr.mxu0 %v2525_v0  ;;  %v163_v1 = vld [vmem:[%s2518_s1 + $0x78] sm:$0xff]  ;;  %v162_v2 = vld [vmem:[%s2518_s1 + $0x70] sm:$0xff]  ;;  %1403 = vmatprep.subr.mxu1 %v2525_v0  ;;  %v161_v3 = vld [vmem:[%s2518_s1 + $0x68] sm:$0xff]  ;;  %vm447_vm3 = vcmask 48128   ;;  %vm1145_vm4 = vcmask 15360  }
   0x2   :  { %250 = vmatpush1.msra.mxu0 %v163_v1  ;;  %v160_v4 = vld [vmem:[%s2518_s1 + $0x60] sm:$0xff]  ;;  %v159_v5 = vld [vmem:[%s2518_s1 + $0x58] sm:$0xff]  ;;  %v158_v6 = vld [vmem:[%s2518_s1 + $0x50] sm:$0xff]  ;;  %1405 = vmatprep.mubr.msk.f32.mxu1 %vm1640_vm2, %v2525_v0 }
   0x3   :  { %251 = vmatprep.subr.mxu0 %v2525_v0  ;;  %v1703_v7 = vld [vmem:[%s2519_s0] sm:$0xff]   ;;  %v157_v9 = vld [vmem:[%s2518_s1 + $0x48] sm:$0xff]  ;;  %v155_v12 = vld [vmem:[%s2518_s1 + $0x38] sm:$0xff] }
   0x4   :  { %252 = vmatpush1.msra.mxu0 %v162_v2  ;;  %v1256_v8 = vunpack.c.1.s8 %v1703_v7  ;;  %v156_v11 = vld [vmem:[%s2518_s1 + $0x40] sm:$0xff]  ;;  %v154_v13 = vld [vmem:[%s2518_s1 + $0x30] sm:$0xff]  ;;  %v153_v14 = vld [vmem:[%s2518_s1 + $0x28] sm:$0xff]  ;;  %v1255_v27 = vunpack.c.0.s8 %v1703_v7  ;;  %v1258_v28 = vunpack.c.3.s8 %v1703_v7  ;;  %v1257_v33 = vunpack.c.2.s8 %v1703_v7 }
   0x5   :  { %253 = vmatprep.subr.mxu0 %v2525_v0  ;;  %v152_v15 = vld [vmem:[%s2518_s1 + $0x20] sm:$0xff]  ;;  %v151_v16 = vld [vmem:[%s2518_s1 + $0x18] sm:$0xff]  ;;  %v150_v17 = vld [vmem:[%s2518_s1 + $0x10] sm:$0xff] }
   0x6   :  { %254 = vmatpush1.msra.mxu0 %v161_v3  ;;  %v1710_v10 = vcvt.s32.f32 %v1256_v8  ;;  %v149_v18 = vld [vmem:[%s2518_s1 + $0x8] sm:$0xff]  ;;  %v148_v19 = vld [vmem:[%s2518_s1] sm:$0xff]  ;;  %v171_v21 = vld [vmem:[%s2518_s1 + $0xb8] sm:$0xff]  ;;  %v1791_v32 = vcvt.s32.f32 %v1255_v27  ;;  %v1794_v34 = vcvt.s32.f32 %v1258_v28  ;;  %v1798_v36 = vcvt.s32.f32 %v1257_v33 }
   0x7   :  { %255 = vmatprep.subr.mxu0 %v2525_v0  ;;  %v172_v20 = vld [vmem:[%s2518_s1 + $0xc0] sm:$0xff]  ;;  %v170_v22 = vld [vmem:[%s2518_s1 + $0xb0] sm:$0xff]  ;;  %v169_v23 = vld [vmem:[%s2518_s1 + $0xa8] sm:$0xff] }
   0x8   :  { %256 = vmatpush1.msra.mxu0 %v160_v4  ;;  %1175 = vmatprep.mubr.msk.f32.mxu0 %vm173_vm0, %v1710_v10  ;;  %v168_v24 = vld [vmem:[%s2518_s1 + $0xa0] sm:$0xff]  ;;  %v167_v25 = vld [vmem:[%s2518_s1 + $0x98] sm:$0xff]  ;;  %v166_v26 = vld [vmem:[%s2518_s1 + $0x90] sm:$0xff] }
   0x9   :  { %257 = vmatprep.subr.mxu0 %v2525_v0  ;;  %v165_v29 = vld [vmem:[%s2518_s1 + $0x88] sm:$0xff]  ;;  %v164_v31 = vld [vmem:[%s2518_s1 + $0x80] sm:$0xff]  ;;  %v1326_v40 = vld [vmem:[%s2519_s0 + $0x10] sm:$0xff]  }
   0xa   :  { %258 = vmatpush1.msra.mxu0 %v159_v5  ;;  %v1325_v30 = vld [vmem:[%s2519_s0 + $0x8] sm:$0xff]   ;;  %v1268_v44 = vunpack.c.1.s8 %v1326_v40  ;;  %v1267_v46 = vunpack.c.0.s8 %v1326_v40  ;;  %v1270_v48 = vunpack.c.3.s8 %v1326_v40  ;;  %v1327_v49 = vld [vmem:[%s2519_s0 + $0x18] sm:$0xff]   ;;  %v1269_v51 = vunpack.c.2.s8 %v1326_v40  ;;  %v1328_v58 = vld [vmem:[%s2519_s0 + $0x20] sm:$0xff]  }
   0xb   :  { %259 = vmatprep.subr.mxu0 %v2525_v0  ;;  %v1262_v35 = vunpack.c.1.s8 %v1325_v30  ;;  %v1261_v37 = vunpack.c.0.s8 %v1325_v30  ;;  %v1264_v39 = vunpack.c.3.s8 %v1325_v30  ;;  %v1263_v42 = vunpack.c.2.s8 %v1325_v30  ;;  %v1329_v4 = vld [vmem:[%s2519_s0 + $0x28] sm:$0xff]   ;;  %v1332_v33 = vld [vmem:[%s2519_s0 + $0x40] sm:$0xff]  }
   0xc   :  { %260 = vmatpush1.msra.mxu0 %v158_v6  ;;  %v1820_v47 = vcvt.s32.f32 %v1268_v44  ;;  %v1826_v50 = vcvt.s32.f32 %v1267_v46  ;;  %v1830_v52 = vcvt.s32.f32 %v1270_v48  ;;  %v1274_v53 = vunpack.c.1.s8 %v1327_v49 }
   0xd   :  { %261 = vmatprep.subr.mxu0 %v2525_v0  ;;  %v1803_v38 = vcvt.s32.f32 %v1262_v35  ;;  %v1809_v41 = vcvt.s32.f32 %v1261_v37  ;;  %v1813_v43 = vcvt.s32.f32 %v1264_v39  ;;  %v1816_v45 = vcvt.s32.f32 %v1263_v42 }
   0xe   :  { %262 = vmatpush1.msra.mxu0 %v157_v9  ;;  %v1833_v54 = vcvt.s32.f32 %v1269_v51  ;;  %v1273_v55 = vunpack.c.0.s8 %v1327_v49  ;;  %v1837_v56 = vcvt.s32.f32 %v1274_v53  ;;  %v1276_v57 = vunpack.c.3.s8 %v1327_v49 }
   0xf   :  { %263 = vmatprep.subr.mxu0 %v2525_v0  ;;  %v1275_v60 = vunpack.c.2.s8 %v1327_v49  ;;  %v1280_v62 = vunpack.c.1.s8 %v1328_v58  ;;  %v1279_v1 = vunpack.c.0.s8 %v1328_v58  ;;  %v1282_v3 = vunpack.c.3.s8 %v1328_v58  ;;  %v1333_v49 = vld [vmem:[%s2519_s0 + $0x48] sm:$0xff]  }
  0x10   :  { %264 = vmatpush1.msra.mxu0 %v156_v11  ;;  %v1843_v59 = vcvt.s32.f32 %v1273_v55  ;;  %v1847_v61 = vcvt.s32.f32 %v1276_v57  ;;  %v1281_v6 = vunpack.c.2.s8 %v1328_v58  ;;  %v1286_v8 = vunpack.c.1.s8 %v1329_v4  ;;  %v439_v58 = vld [vmem:[%s2520_s2] sm:$0x3f] }
  0x11   :  { %265 = vmatprep.subr.mxu0 %v2525_v0  ;;  %v1850_v63 = vcvt.s32.f32 %v1275_v60  ;;  %v1854_v2 = vcvt.s32.f32 %v1280_v62  ;;  %v1860_v5 = vcvt.s32.f32 %v1279_v1  ;;  %v1864_v7 = vcvt.s32.f32 %v1282_v3  ;;  %1404 = vmatpush3.msk.msra.mxu1 %vm523_vm1, %v439_v58 }
  0x12   :  { %266 = vmatpush1.msra.mxu0 %v155_v12  ;;  %v1867_v9 = vcvt.s32.f32 %v1281_v6  ;;  %v1285_v11 = vunpack.c.0.s8 %v1329_v4  ;;  %v1871_v12 = vcvt.s32.f32 %v1286_v8  ;;  %v1304_v40 = vunpack.c.1.s8 %v1332_v33  ;;  %1480 = vmatprep.subr.mxu1 %v2525_v0 }
  0x13   :  { %267 = vmatprep.subr.mxu0 %v2525_v0  ;;  %v1303_v44 = vunpack.c.0.s8 %v1332_v33  ;;  %v1306_v48 = vunpack.c.3.s8 %v1332_v33  ;;  %v1305_v53 = vunpack.c.2.s8 %v1332_v33  ;;  %v1310_v57 = vunpack.c.1.s8 %v1333_v49 }
  0x14   :  { %268 = vmatpush1.msra.mxu0 %v154_v13  ;;  %v1288_v13 = vunpack.c.3.s8 %v1329_v4  ;;  %v1922_v46 = vcvt.s32.f32 %v1304_v40  ;;  %v1309_v62 = vunpack.c.0.s8 %v1333_v49  ;;  %v1312_v3 = vunpack.c.3.s8 %v1333_v49 }
  0x15   :  { %269 = vmatprep.subr.mxu0 %v2525_v0  ;;  %v1928_v51 = vcvt.s32.f32 %v1303_v44  ;;  %v1932_v55 = vcvt.s32.f32 %v1306_v48  ;;  %v1938_v60 = vcvt.s32.f32 %v1305_v53  ;;  %v1942_v1 = vcvt.s32.f32 %v1310_v57  ;;  %v47_v44 = vld [vmem:[%s2519_s0 + $0x60] sm:$0xf] }
  0x16   :  { %270 = vmatpush1.msra.mxu0 %v153_v14  ;;  %v1330_v14 = vld [vmem:[%s2519_s0 + $0x30] sm:$0xff]   ;;  %2541 = vst [vmem:[#allocation6_spill] sm:$0xff] %v1922_v46  ;;  %v1951_v6 = vcvt.s32.f32 %v1309_v62  ;;  %v1311_v8 = vunpack.c.2.s8 %v1333_v49  ;;  %v97_v57 = vunpack.c.1.s8 %v47_v44  ;;  %v96_v62 = vunpack.c.0.s8 %v47_v44 }
  0x17   :  { %271 = vmatprep.subr.mxu0 %v2525_v0  ;;  %2542 = vst [vmem:[#allocation7_spill] sm:$0xff] %v1928_v51  ;;  %2543 = vst [vmem:[#allocation8_spill] sm:$0xff] %v1932_v55  ;;  %v752_v44 = vld [vmem:[%s2521_s4 + $0x50] sm:$0xff] }
  0x18   :  { %272 = vmatpush1.msra.mxu0 %v152_v15  ;;  %v1877_v15 = vcvt.s32.f32 %v1285_v11  ;;  %2544 = vst [vmem:[#allocation9_spill] sm:$0xff] %v1938_v60  ;;  %2545 = vst [vmem:[#allocation10_spill] sm:$0xff] %v1942_v1  ;;  %v1955_v11 = vcvt.s32.f32 %v1312_v3  ;;  %v1996_v3 = vcvt.s32.f32 %v97_v57  ;;  %v751_v57 = vld [vmem:[%s2521_s4 + $0x48] sm:$0xff] }
  0x19   :  { %273 = vmatprep.subr.mxu0 %v2525_v0  ;;  %2546 = vst [vmem:[#allocation11_spill] sm:$0xff] %v1951_v6 }
  0x1a   :  { %274 = vmatpush1.msra.mxu0 %v151_v16  ;;  %v1287_v16 = vunpack.c.2.s8 %v1329_v4  ;;  %v1334_v4 = vld [vmem:[%s2519_s0 + $0x50] sm:$0xff]  }
  0x1b   :  { %275 = vmatprep.subr.mxu0 %v2525_v0 }
  0x1c   :  { %276 = vmatpush1.msra.mxu0 %v150_v17  ;;  %v1881_v17 = vcvt.s32.f32 %v1288_v13  ;;  %v1316_v13 = vunpack.c.1.s8 %v1334_v4 }
  0x1d   :  { %277 = vmatprep.subr.mxu0 %v2525_v0 }
  0x1e   :  { %278 = vmatpush1.msra.mxu0 %v149_v18  ;;  %v1292_v18 = vunpack.c.1.s8 %v1330_v14 }
  0x1f   :  { %279 = vmatprep.subr.mxu0 %v2525_v0 }
  0x20   :  { %280 = vmatpush1.msra.mxu0 %v148_v19  ;;  %v1884_v19 = vcvt.s32.f32 %v1287_v16  ;;  %v1315_v16 = vunpack.c.0.s8 %v1334_v4 }
  0x21   :  { %295 = vmatprep.subr.mxu0 %v2525_v0 }
  0x22   :  { %296 = vmatpush2.msra.mxu0 %v172_v20  ;;  %v1291_v20 = vunpack.c.0.s8 %v1330_v14 }
  0x23   :  { %297 = vmatprep.subr.mxu0 %v2525_v0 }
  0x24   :  { %298 = vmatpush2.msra.mxu0 %v171_v21  ;;  %v1888_v21 = vcvt.s32.f32 %v1292_v18  ;;  %v1962_v18 = vcvt.s32.f32 %v1316_v13 }
  0x25   :  { %299 = vmatprep.subr.mxu0 %v2525_v0 }
  0x26   :  { %300 = vmatpush2.msra.mxu0 %v170_v22  ;;  %v1294_v22 = vunpack.c.3.s8 %v1330_v14 }
  0x27   :  { %301 = vmatprep.subr.mxu0 %v2525_v0 }
  0x28   :  { %302 = vmatpush2.msra.mxu0 %v169_v23  ;;  %v1331_v23 = vld [vmem:[%s2519_s0 + $0x38] sm:$0xff]  }
  0x29   :  { %303 = vmatprep.subr.mxu0 %v2525_v0  ;;  %v1298_v27 = vunpack.c.1.s8 %v1331_v23  ;;  %v1299_v37 = vunpack.c.2.s8 %v1331_v23 }
  0x2a   :  { %304 = vmatpush2.msra.mxu0 %v168_v24  ;;  %v1894_v24 = vcvt.s32.f32 %v1291_v20  ;;  %v1318_v20 = vunpack.c.3.s8 %v1334_v4 }
  0x2b   :  { %305 = vmatprep.subr.mxu0 %v2525_v0  ;;  %v1905_v30 = vcvt.s32.f32 %v1298_v27  ;;  %v1918_v42 = vcvt.s32.f32 %v1299_v37 }
  0x2c   :  { %306 = vmatpush2.msra.mxu0 %v167_v25  ;;  %v1293_v25 = vunpack.c.2.s8 %v1330_v14  ;;  %v1958_v14 = vcvt.s32.f32 %v1311_v8  ;;  %v1972_v27 = vcvt.s32.f32 %v1318_v20  ;;  %v757_v8 = vld [vmem:[%s2521_s4 + $0x78] sm:$0xff] }
  0x2d   :  { %307 = vmatprep.subr.mxu0 %v2525_v0  ;;  %2537 = vst [vmem:[#allocation2_spill] sm:$0xff] %v1905_v30  ;;  %2540 = vst [vmem:[#allocation5_spill] sm:$0xff] %v1918_v42 }
  0x2e   :  { %308 = vmatpush2.msra.mxu0 %v166_v26  ;;  %v1898_v26 = vcvt.s32.f32 %v1294_v22  ;;  %v1901_v28 = vcvt.s32.f32 %v1293_v25  ;;  %v1335_v22 = vld [vmem:[%s2519_s0 + $0x58] sm:$0xff]   ;;  %v1317_v25 = vunpack.c.2.s8 %v1334_v4  ;;  %v1999_v4 = vcvt.s32.f32 %v96_v62 }
  0x2f   :  { %309 = vmatprep.subr.mxu0 %v2525_v0  ;;  %v1321_v33 = vunpack.c.0.s8 %v1335_v22  ;;  %v1324_v40 = vunpack.c.3.s8 %v1335_v22  ;;  %v1323_v49 = vunpack.c.2.s8 %v1335_v22 }
  0x30   :  { %310 = vmatpush2.msra.mxu0 %v165_v29  ;;  %v1297_v29 = vunpack.c.0.s8 %v1331_v23 }
  0x31   :  { %311 = vmatprep.subr.mxu0 %v2525_v0  ;;  %v1985_v48 = vcvt.s32.f32 %v1321_v33  ;;  %v1989_v53 = vcvt.s32.f32 %v1324_v40  ;;  %v1992_v58 = vcvt.s32.f32 %v1323_v49  ;;  %v753_v33 = vld [vmem:[%s2521_s4 + $0x58] sm:$0xff] }
  0x32   :  { %312 = vmatpush2.msra.mxu0 %v164_v31  ;;  %v1300_v31 = vunpack.c.3.s8 %v1331_v23  ;;  %v1911_v35 = vcvt.s32.f32 %v1297_v29  ;;  %v1968_v23 = vcvt.s32.f32 %v1315_v16  ;;  %v1322_v29 = vunpack.c.1.s8 %v1335_v22  ;;  %v756_v16 = vld [vmem:[%s2521_s4 + $0x70] sm:$0xff] }
  0x33   :  { %314 = vmatmul.mubr.f32.vlgmr.msra.gmra.mxu0 %v1791_v32  ;;  %955 = vmatprep.subr.mxu0 %v2525_v0 }
  0x34   :  { %1176 = vmatprep.mubr.msk.f32.mxu0 %vm173_vm0, %v1794_v34  ;;  %2538 = vst [vmem:[#allocation3_spill] sm:$0xff] %v1911_v35  ;;  %v1915_v39 = vcvt.s32.f32 %v1300_v31  ;;  %v1975_v31 = vcvt.s32.f32 %v1317_v25  ;;  %v1979_v37 = vcvt.s32.f32 %v1322_v29  ;;  %v754_v25 = vld [vmem:[%s2521_s4 + $0x60] sm:$0xff] }
  0x36   :  { %2539 = vst [vmem:[#allocation4_spill] sm:$0xff] %v1915_v39 }
  0x37   :  { %319 = vmatmul.mubr.f32.gmra.mxu0 %v1798_v36 }
  0x38   :  { %1177 = vmatprep.mubr.msk.f32.mxu0 %vm173_vm0, %v1803_v38 }
  0x3b   :  { %324 = vmatmul.mubr.f32.gmra.mxu0 %v1809_v41 }
  0x3c   :  { %1178 = vmatprep.mubr.msk.f32.mxu0 %vm173_vm0, %v1813_v43 }
  0x3f   :  { %329 = vmatmul.mubr.f32.gmra.mxu0 %v1816_v45 }
  0x40   :  { %1179 = vmatprep.mubr.msk.f32.mxu0 %vm173_vm0, %v1820_v47 }
  0x43   :  { %334 = vmatmul.mubr.f32.gmra.mxu0 %v1826_v50 }
  0x44   :  { %1180 = vmatprep.mubr.msk.f32.mxu0 %vm173_vm0, %v1830_v52 }
  0x47   :  { %339 = vmatmul.mubr.f32.gmra.mxu0 %v1833_v54 }
  0x48   :  { %1181 = vmatprep.mubr.msk.f32.mxu0 %vm173_vm0, %v1837_v56 }
  0x4b   :  { %344 = vmatmul.mubr.f32.gmra.mxu0 %v1843_v59 }
  0x4c   :  { %1182 = vmatprep.mubr.msk.f32.mxu0 %vm173_vm0, %v1847_v61 }
  0x4f   :  { %349 = vmatmul.mubr.f32.gmra.mxu0 %v1850_v63 }
  0x50   :  { %1183 = vmatprep.mubr.msk.f32.mxu0 %vm173_vm0, %v1854_v2 }
  0x53   :  { %354 = vmatmul.mubr.f32.gmra.mxu0 %v1860_v5 }
  0x54   :  { %1184 = vmatprep.mubr.msk.f32.mxu0 %vm173_vm0, %v1864_v7 }
  0x57   :  { %359 = vmatmul.mubr.f32.gmra.mxu0 %v1867_v9 }
  0x58   :  { %1185 = vmatprep.mubr.msk.f32.mxu0 %vm173_vm0, %v1871_v12 }
  0x5b   :  { %364 = vmatmul.mubr.f32.gmra.mxu0 %v1877_v15 }
  0x5c   :  { %1186 = vmatprep.mubr.msk.f32.mxu0 %vm173_vm0, %v1881_v17 }
  0x5f   :  { %369 = vmatmul.mubr.f32.gmra.mxu0 %v1884_v19 }
  0x60   :  { %1187 = vmatprep.mubr.msk.f32.mxu0 %vm173_vm0, %v1888_v21 }
  0x63   :  { %374 = vmatmul.mubr.f32.gmra.mxu0 %v1894_v24 }
  0x64   :  { %1188 = vmatprep.mubr.msk.f32.mxu0 %vm173_vm0, %v1898_v26 }
  0x67   :  { %379 = vmatmul.mubr.f32.gmra.mxu0 %v1901_v28 }
  0x68   :  { %1189 = vmatprep.mubr.msk.f32.mxu0 %vm173_vm0, %v1905_v30  ;;  %v2547_v30 = vmov 0.0  }
  0x6b   :  { %384 = vmatmul.mubr.f32.gmra.mxu0 %v1911_v35 }
  0x6c   :  { %1190 = vmatprep.mubr.msk.f32.mxu0 %vm173_vm0, %v1915_v39 }
  0x6f   :  { %389 = vmatmul.mubr.f32.gmra.mxu0 %v1918_v42 }
  0x70   :  { %1191 = vmatprep.mubr.msk.f32.mxu0 %vm173_vm0, %v1922_v46 }
  0x73   :  { %394 = vmatmul.mubr.f32.gmra.mxu0 %v1928_v51 }
  0x74   :  { %1192 = vmatprep.mubr.msk.f32.mxu0 %vm173_vm0, %v1932_v55 }
  0x77   :  { %399 = vmatmul.mubr.f32.gmra.mxu0 %v1938_v60 }
  0x78   :  { %1193 = vmatprep.mubr.msk.f32.mxu0 %vm173_vm0, %v1942_v1 }
  0x7b   :  { %404 = vmatmul.mubr.f32.gmra.mxu0 %v1951_v6 }
  0x7c   :  { %1194 = vmatprep.mubr.msk.f32.mxu0 %vm173_vm0, %v1955_v11 }
  0x7f   :  { %409 = vmatmul.mubr.f32.gmra.mxu0 %v1958_v14 }
  0x80   :  { %1195 = vmatprep.mubr.msk.f32.mxu0 %vm173_vm0, %v1962_v18 }
  0x83   :  { %414 = vmatmul.mubr.f32.gmra.mxu0 %v1968_v23 }
  0x84   :  { %1196 = vmatprep.mubr.msk.f32.mxu0 %vm173_vm0, %v1972_v27 }
  0x87   :  { %419 = vmatmul.mubr.f32.gmra.mxu0 %v1975_v31 }
  0x88   :  { %1197 = vmatprep.mubr.msk.f32.mxu0 %vm173_vm0, %v1979_v37 }
  0x8b   :  { %424 = vmatmul.mubr.f32.gmra.mxu0 %v1985_v48 }
  0x8c   :  { %1198 = vmatprep.mubr.msk.f32.mxu0 %vm173_vm0, %v1989_v53 }
  0x8f   :  { %429 = vmatmul.mubr.f32.gmra.mxu0 %v1992_v58 }
  0x90   :  { %1199 = vmatprep.mubr.msk.f32.mxu0 %vm173_vm0, %v1996_v3 }
  0x93   :  { %434 = vmatmul.mubr.f32.gmra.mxu0 %v1999_v4 }
  0x94   :  { %1228 = vmatprep.mubr.msk.f32.mxu0 %vm173_vm0, %v1710_v10  ;;  %v755_v10 = vld [vmem:[%s2521_s4 + $0x68] sm:$0xff] }
  0xf3   :  { %v315_v13 = vpop.f32.mrf.mxu0 }
  0xf4   :  { %1406 = vmatmul.mubr.msk.f32.vlgmr.msra.gmra.mxu1 %vm447_vm3, %v315_v13 }
  0xf5   :  { %v317_v20 = vpop.f32.mrf.mxu0  ;;  %1408 = vmatprep.mubr.msk.f32.mxu1 %vm1640_vm2, %v2525_v0  ;;  %1481 = vmatpush3.msra.mxu1 %v757_v8  ;;  %v750_v8 = vld [vmem:[%s2521_s4 + $0x40] sm:$0xff] }
  0xf6   :  { %1482 = vmatprep.subr.mxu1 %v2525_v0 }
  0xf7   :  { %v320_v22 = vpop.f32.mrf.mxu0  ;;  %1483 = vmatpush3.msra.mxu1 %v756_v16  ;;  %v749_v16 = vld [vmem:[%s2521_s4 + $0x38] sm:$0xff] }
  0xf8   :  { %1409 = vmatmul.mubr.msk.f32.gmra.mxu1 %vm447_vm3, %v320_v22  ;;  %1484 = vmatprep.subr.mxu1 %v2525_v0 }
  0xf9   :  { %v322_v29 = vpop.f32.mrf.mxu0  ;;  %1411 = vmatprep.mubr.msk.f32.mxu1 %vm1640_vm2, %v2525_v0  ;;  %1485 = vmatpush3.msra.mxu1 %v755_v10  ;;  %v748_v10 = vld [vmem:[%s2521_s4 + $0x30] sm:$0xff] }
  0xfa   :  { %1486 = vmatprep.subr.mxu1 %v2525_v0 }
  0xfb   :  { %v325_v40 = vpop.f32.mrf.mxu0  ;;  %1487 = vmatpush3.msra.mxu1 %v754_v25  ;;  %v747_v25 = vld [vmem:[%s2521_s4 + $0x28] sm:$0xff] }
  0xfc   :  { %1412 = vmatmul.mubr.msk.f32.gmra.mxu1 %vm447_vm3, %v325_v40  ;;  %1488 = vmatprep.subr.mxu1 %v2525_v0 }
  0xfd   :  { %v327_v49 = vpop.f32.mrf.mxu0  ;;  %1414 = vmatprep.mubr.msk.f32.mxu1 %vm1640_vm2, %v2525_v0  ;;  %1489 = vmatpush3.msra.mxu1 %v753_v33  ;;  %v746_v33 = vld [vmem:[%s2521_s4 + $0x20] sm:$0xff] }
  0xfe   :  { %1490 = vmatprep.subr.mxu1 %v2525_v0 }
  0xff   :  { %v330_v62 = vpop.f32.mrf.mxu0  ;;  %1491 = vmatpush3.msra.mxu1 %v752_v44  ;;  %v745_v44 = vld [vmem:[%s2521_s4 + $0x18] sm:$0xff] }
 0x100   :  { %1415 = vmatmul.mubr.msk.f32.gmra.mxu1 %vm447_vm3, %v330_v62  ;;  %1492 = vmatprep.subr.mxu1 %v2525_v0 }
 0x101   :  { %v332_v13 = vpop.f32.mrf.mxu0  ;;  %1417 = vmatprep.mubr.msk.f32.mxu1 %vm1640_vm2, %v2525_v0  ;;  %1493 = vmatpush3.msra.mxu1 %v751_v57 }
 0x102   :  { %1494 = vmatprep.subr.mxu1 %v2525_v0 }
 0x103   :  { %v335_v20 = vpop.f32.mrf.mxu0  ;;  %1495 = vmatpush3.msra.mxu1 %v750_v8 }
 0x104   :  { %1418 = vmatmul.mubr.msk.f32.gmra.mxu1 %vm447_vm3, %v335_v20  ;;  %1496 = vmatprep.subr.mxu1 %v2525_v0 }
 0x105   :  { %v337_v22 = vpop.f32.mrf.mxu0  ;;  %1420 = vmatprep.mubr.msk.f32.mxu1 %vm1640_vm2, %v2525_v0  ;;  %1497 = vmatpush3.msra.mxu1 %v749_v16 }
 0x106   :  { %1498 = vmatprep.subr.mxu1 %v2525_v0 }
 0x107   :  { %v340_v29 = vpop.f32.mrf.mxu0  ;;  %1499 = vmatpush3.msra.mxu1 %v748_v10 }
 0x108   :  { %1421 = vmatmul.mubr.msk.f32.gmra.mxu1 %vm447_vm3, %v340_v29  ;;  %1500 = vmatprep.subr.mxu1 %v2525_v0 }
 0x109   :  { %v342_v40 = vpop.f32.mrf.mxu0  ;;  %1423 = vmatprep.mubr.msk.f32.mxu1 %vm1640_vm2, %v2525_v0  ;;  %1501 = vmatpush3.msra.mxu1 %v747_v25 }
 0x10a   :  { %1502 = vmatprep.subr.mxu1 %v2525_v0 }
 0x10b   :  { %v345_v49 = vpop.f32.mrf.mxu0  ;;  %1503 = vmatpush3.msra.mxu1 %v746_v33 }
 0x10c   :  { %1424 = vmatmul.mubr.msk.f32.gmra.mxu1 %vm447_vm3, %v345_v49  ;;  %1504 = vmatprep.subr.mxu1 %v2525_v0 }
 0x10d   :  { %v347_v57 = vpop.f32.mrf.mxu0  ;;  %1426 = vmatprep.mubr.msk.f32.mxu1 %vm1640_vm2, %v2525_v0  ;;  %1505 = vmatpush3.msra.mxu1 %v745_v44 }
 0x10e   :  { %1506 = vmatprep.subr.mxu1 %v2525_v0 }
 0x10f   :  { %v350_v62 = vpop.f32.mrf.mxu0 }
 0x110   :  { %1427 = vmatmul.mubr.msk.f32.gmra.mxu1 %vm447_vm3, %v350_v62 }
 0x111   :  { %v352_v8 = vpop.f32.mrf.mxu0  ;;  %1429 = vmatprep.mubr.msk.f32.mxu1 %vm1640_vm2, %v2525_v0 }
 0x113   :  { %v355_v13 = vpop.f32.mrf.mxu0 }
 0x114   :  { %1430 = vmatmul.mubr.msk.f32.gmra.mxu1 %vm447_vm3, %v355_v13 }
 0x115   :  { %v357_v16 = vpop.f32.mrf.mxu0  ;;  %1432 = vmatprep.mubr.msk.f32.mxu1 %vm1640_vm2, %v2525_v0 }
 0x117   :  { %v360_v20 = vpop.f32.mrf.mxu0 }
 0x118   :  { %1433 = vmatmul.mubr.msk.f32.gmra.mxu1 %vm447_vm3, %v360_v20 }
 0x119   :  { %v362_v10 = vpop.f32.mrf.mxu0  ;;  %1435 = vmatprep.mubr.msk.f32.mxu1 %vm1640_vm2, %v2525_v0 }
 0x11a   :  { %v744_v10 = vld [vmem:[%s2521_s4 + $0x10] sm:$0xff] }
 0x11b   :  { %v365_v22 = vpop.f32.mrf.mxu0  ;;  %1507 = vmatpush3.msra.mxu1 %v744_v10 }
 0x11c   :  { %1436 = vmatmul.mubr.msk.f32.gmra.mxu1 %vm447_vm3, %v365_v22  ;;  %1508 = vmatprep.subr.mxu1 %v2525_v0 }
 0x11d   :  { %v367_v25 = vpop.f32.mrf.mxu0  ;;  %1438 = vmatprep.mubr.msk.f32.mxu1 %vm1640_vm2, %v2525_v0 }
 0x11e   :  { %v743_v25 = vld [vmem:[%s2521_s4 + $0x8] sm:$0xff] }
 0x11f   :  { %v370_v29 = vpop.f32.mrf.mxu0  ;;  %1509 = vmatpush3.msra.mxu1 %v743_v25 }
 0x120   :  { %1439 = vmatmul.mubr.msk.f32.gmra.mxu1 %vm447_vm3, %v370_v29  ;;  %1510 = vmatprep.subr.mxu1 %v2525_v0 }
 0x121   :  { %v372_v33 = vpop.f32.mrf.mxu0  ;;  %1441 = vmatprep.mubr.msk.f32.mxu1 %vm1640_vm2, %v2525_v0 }
 0x122   :  { %v742_v33 = vld [vmem:[%s2521_s4] sm:$0xff] }
 0x123   :  { %v375_v40 = vpop.f32.mrf.mxu0  ;;  %1511 = vmatpush3.msra.mxu1 %v742_v33 }
 0x124   :  { %1442 = vmatmul.mubr.msk.f32.gmra.mxu1 %vm447_vm3, %v375_v40  ;;  %1587 = vmatprep.subr.mxu1 %v2525_v0 }
 0x125   :  { %v377_v44 = vpop.f32.mrf.mxu0  ;;  %1444 = vmatprep.mubr.msk.f32.mxu1 %vm1640_vm2, %v2525_v0 }
 0x127   :  { %v380_v49 = vpop.f32.mrf.mxu0 }
 0x128   :  { %1445 = vmatmul.mubr.msk.f32.gmra.mxu1 %vm447_vm3, %v380_v49 }
 0x129   :  { %v382_v57 = vpop.f32.mrf.mxu0  ;;  %1447 = vmatprep.mubr.msk.f32.mxu1 %vm1640_vm2, %v2525_v0 }
 0x12b   :  { %v385_v62 = vpop.f32.mrf.mxu0 }
 0x12c   :  { %1448 = vmatmul.mubr.msk.f32.gmra.mxu1 %vm447_vm3, %v385_v62 }
 0x12d   :  { %v387_v8 = vpop.f32.mrf.mxu0  ;;  %1450 = vmatprep.mubr.msk.f32.mxu1 %vm1640_vm2, %v2525_v0 }
 0x12f   :  { %v390_v13 = vpop.f32.mrf.mxu0 }
 0x130   :  { %1451 = vmatmul.mubr.msk.f32.gmra.mxu1 %vm447_vm3, %v390_v13 }
 0x131   :  { %v392_v16 = vpop.f32.mrf.mxu0  ;;  %1453 = vmatprep.mubr.msk.f32.mxu1 %vm1640_vm2, %v2525_v0 }
 0x133   :  { %v395_v20 = vpop.f32.mrf.mxu0 }
 0x134   :  { %1454 = vmatmul.mubr.msk.f32.gmra.mxu1 %vm447_vm3, %v395_v20 }
 0x135   :  { %v397_v22 = vpop.f32.mrf.mxu0  ;;  %1456 = vmatprep.mubr.msk.f32.mxu1 %vm1640_vm2, %v2525_v0 }
 0x137   :  { %v400_v29 = vpop.f32.mrf.mxu0 }
 0x138   :  { %1457 = vmatmul.mubr.msk.f32.gmra.mxu1 %vm447_vm3, %v400_v29 }
 0x139   :  { %v402_v40 = vpop.f32.mrf.mxu0  ;;  %1459 = vmatprep.mubr.msk.f32.mxu1 %vm1640_vm2, %v2525_v0 }
 0x13b   :  { %v405_v44 = vpop.f32.mrf.mxu0 }
 0x13c   :  { %1460 = vmatmul.mubr.msk.f32.gmra.mxu1 %vm447_vm3, %v405_v44  ;;  %v2148_v44 = vld [vmem:[%s2522_s3] ss:$0 sm:$0xff] }
 0x13d   :  { %v407_v49 = vpop.f32.mrf.mxu0  ;;  %1462 = vmatprep.mubr.msk.f32.mxu1 %vm1640_vm2, %v2525_v0 }
 0x13f   :  { %v410_v57 = vpop.f32.mrf.mxu0 }
 0x140   :  { %1463 = vmatmul.mubr.msk.f32.gmra.mxu1 %vm447_vm3, %v410_v57 }
 0x141   :  { %v412_v62 = vpop.f32.mrf.mxu0  ;;  %1465 = vmatprep.mubr.msk.f32.mxu1 %vm1640_vm2, %v2525_v0 }
 0x143   :  { %v415_v8 = vpop.f32.mrf.mxu0 }
 0x144   :  { %1466 = vmatmul.mubr.msk.f32.gmra.mxu1 %vm447_vm3, %v415_v8 }
 0x145   :  { %v417_v13 = vpop.f32.mrf.mxu0  ;;  %1468 = vmatprep.mubr.msk.f32.mxu1 %vm1640_vm2, %v2525_v0 }
 0x147   :  { %v420_v16 = vpop.f32.mrf.mxu0 }
 0x148   :  { %1469 = vmatmul.mubr.msk.f32.gmra.mxu1 %vm447_vm3, %v420_v16 }
 0x149   :  { %v422_v20 = vpop.f32.mrf.mxu0  ;;  %1471 = vmatprep.mubr.msk.f32.mxu1 %vm1640_vm2, %v2525_v0 }
 0x14b   :  { %v425_v10 = vpop.f32.mrf.mxu0 }
 0x14c   :  { %1472 = vmatmul.mubr.msk.f32.gmra.mxu1 %vm447_vm3, %v425_v10 }
 0x14d   :  { %v427_v22 = vpop.f32.mrf.mxu0  ;;  %1474 = vmatprep.mubr.msk.f32.mxu1 %vm1640_vm2, %v2525_v0 }
 0x14f   :  { %v430_v25 = vpop.f32.mrf.mxu0 }
 0x150   :  { %1475 = vmatmul.mubr.msk.f32.gmra.mxu1 %vm447_vm3, %v430_v25 }
 0x151   :  { %v432_v29 = vpop.f32.mrf.mxu0  ;;  %1477 = vmatprep.mubr.msk.f32.mxu1 %vm1640_vm2, %v2525_v0 }
 0x153   :  { %v435_v33 = vpop.f32.mrf.mxu0 }
 0x154   :  { %1478 = vmatmul.mubr.msk.f32.gmra.mxu1 %vm447_vm3, %v435_v33 }
 0x155   :  { %v437_v40 = vpop.f32.mrf.mxu0  ;;  %1512 = vmatprep.mubr.msk.f32.mxu1 %vm1640_vm2, %v2525_v0 }
 0x1b4   :  { %v593_v49 = vpop.f32.mrf.mxu1 }
 0x1b5   :  { %v594_v57 = vadd.f32 %v2148_v44, %v593_v49 }
 0x1b6   :  { %v1407_v62 = vpop.f32.mrf.mxu1 }
 0x1b7   :  { %v717_v8 = vmax.f32 %v594_v57, 0.0 }
 0x1b8   :  { %v598_v13 = vpop.f32.mrf.mxu1 }
 0x1b9   :  { %v599_v16 = vadd.f32 %v2148_v44, %v598_v13  ;;  %1513 = vmatmul.mubr.f32.vlgmr.msra.gmra.mxu1 %v717_v8 }
 0x1ba   :  { %v1410_v20 = vpop.f32.mrf.mxu1  ;;  %1515 = vmatprep.mubr.msk.f32.mxu1 %vm1640_vm2, %v2525_v0 }
 0x1bb   :  { %v718_v10 = vmax.f32 %v599_v16, 0.0 }
 0x1bc   :  { %v603_v22 = vpop.f32.mrf.mxu1 }
 0x1bd   :  { %v604_v25 = vadd.f32 %v2148_v44, %v603_v22  ;;  %1516 = vmatmul.mubr.f32.gmra.mxu1 %v718_v10 }
 0x1be   :  { %v1413_v29 = vpop.f32.mrf.mxu1  ;;  %1518 = vmatprep.mubr.msk.f32.mxu1 %vm1640_vm2, %v2525_v0 }
 0x1bf   :  { %v719_v33 = vmax.f32 %v604_v25, 0.0 }
 0x1c0   :  { %v608_v40 = vpop.f32.mrf.mxu1 }
 0x1c1   :  { %v609_v49 = vadd.f32 %v2148_v44, %v608_v40  ;;  %1519 = vmatmul.mubr.f32.gmra.mxu1 %v719_v33 }
 0x1c2   :  { %v1416_v57 = vpop.f32.mrf.mxu1  ;;  %1521 = vmatprep.mubr.msk.f32.mxu1 %vm1640_vm2, %v2525_v0 }
 0x1c3   :  { %v720_v62 = vmax.f32 %v609_v49, 0.0 }
 0x1c4   :  { %v613_v8 = vpop.f32.mrf.mxu1 }
 0x1c5   :  { %v614_v13 = vadd.f32 %v2148_v44, %v613_v8  ;;  %1522 = vmatmul.mubr.f32.gmra.mxu1 %v720_v62 }
 0x1c6   :  { %v1419_v16 = vpop.f32.mrf.mxu1  ;;  %1524 = vmatprep.mubr.msk.f32.mxu1 %vm1640_vm2, %v2525_v0 }
 0x1c7   :  { %v721_v20 = vmax.f32 %v614_v13, 0.0 }
 0x1c8   :  { %v618_v10 = vpop.f32.mrf.mxu1 }
 0x1c9   :  { %v619_v22 = vadd.f32 %v2148_v44, %v618_v10  ;;  %1525 = vmatmul.mubr.f32.gmra.mxu1 %v721_v20 }
 0x1ca   :  { %v1422_v25 = vpop.f32.mrf.mxu1  ;;  %1527 = vmatprep.mubr.msk.f32.mxu1 %vm1640_vm2, %v2525_v0 }
 0x1cb   :  { %v722_v29 = vmax.f32 %v619_v22, 0.0 }
 0x1cc   :  { %v623_v33 = vpop.f32.mrf.mxu1 }
 0x1cd   :  { %v624_v40 = vadd.f32 %v2148_v44, %v623_v33  ;;  %1528 = vmatmul.mubr.f32.gmra.mxu1 %v722_v29 }
 0x1ce   :  { %v1425_v49 = vpop.f32.mrf.mxu1  ;;  %1530 = vmatprep.mubr.msk.f32.mxu1 %vm1640_vm2, %v2525_v0 }
 0x1cf   :  { %v723_v57 = vmax.f32 %v624_v40, 0.0 }
 0x1d0   :  { %v628_v62 = vpop.f32.mrf.mxu1 }
 0x1d1   :  { %v629_v8 = vadd.f32 %v2148_v44, %v628_v62  ;;  %1531 = vmatmul.mubr.f32.gmra.mxu1 %v723_v57 }
 0x1d2   :  { %v1428_v13 = vpop.f32.mrf.mxu1  ;;  %1533 = vmatprep.mubr.msk.f32.mxu1 %vm1640_vm2, %v2525_v0 }
 0x1d3   :  { %v724_v16 = vmax.f32 %v629_v8, 0.0 }
 0x1d4   :  { %v633_v20 = vpop.f32.mrf.mxu1 }
 0x1d5   :  { %v634_v10 = vadd.f32 %v2148_v44, %v633_v20  ;;  %1534 = vmatmul.mubr.f32.gmra.mxu1 %v724_v16 }
 0x1d6   :  { %v1431_v22 = vpop.f32.mrf.mxu1  ;;  %1536 = vmatprep.mubr.msk.f32.mxu1 %vm1640_vm2, %v2525_v0 }
 0x1d7   :  { %v725_v25 = vmax.f32 %v634_v10, 0.0 }
 0x1d8   :  { %v638_v29 = vpop.f32.mrf.mxu1 }
 0x1d9   :  { %v639_v33 = vadd.f32 %v2148_v44, %v638_v29  ;;  %1537 = vmatmul.mubr.f32.gmra.mxu1 %v725_v25 }
 0x1da   :  { %v1434_v40 = vpop.f32.mrf.mxu1  ;;  %1539 = vmatprep.mubr.msk.f32.mxu1 %vm1640_vm2, %v2525_v0 }
 0x1db   :  { %v726_v49 = vmax.f32 %v639_v33, 0.0 }
 0x1dc   :  { %v643_v57 = vpop.f32.mrf.mxu1 }
 0x1dd   :  { %v644_v62 = vadd.f32 %v2148_v44, %v643_v57  ;;  %1540 = vmatmul.mubr.f32.gmra.mxu1 %v726_v49 }
 0x1de   :  { %v1437_v8 = vpop.f32.mrf.mxu1  ;;  %1542 = vmatprep.mubr.msk.f32.mxu1 %vm1640_vm2, %v2525_v0 }
 0x1df   :  { %v727_v13 = vmax.f32 %v644_v62, 0.0 }
 0x1e0   :  { %v648_v16 = vpop.f32.mrf.mxu1 }
 0x1e1   :  { %v649_v20 = vadd.f32 %v2148_v44, %v648_v16  ;;  %1543 = vmatmul.mubr.f32.gmra.mxu1 %v727_v13 }
 0x1e2   :  { %v1440_v10 = vpop.f32.mrf.mxu1  ;;  %1545 = vmatprep.mubr.msk.f32.mxu1 %vm1640_vm2, %v2525_v0 }
 0x1e3   :  { %v728_v22 = vmax.f32 %v649_v20, 0.0 }
 0x1e4   :  { %v653_v25 = vpop.f32.mrf.mxu1 }
 0x1e5   :  { %v654_v29 = vadd.f32 %v2148_v44, %v653_v25  ;;  %1546 = vmatmul.mubr.f32.gmra.mxu1 %v728_v22 }
 0x1e6   :  { %v1443_v33 = vpop.f32.mrf.mxu1  ;;  %1548 = vmatprep.mubr.msk.f32.mxu1 %vm1640_vm2, %v2525_v0 }
 0x1e7   :  { %v729_v40 = vmax.f32 %v654_v29, 0.0 }
 0x1e8   :  { %v658_v49 = vpop.f32.mrf.mxu1 }
 0x1e9   :  { %v659_v57 = vadd.f32 %v2148_v44, %v658_v49  ;;  %1549 = vmatmul.mubr.f32.gmra.mxu1 %v729_v40 }
 0x1ea   :  { %v1446_v62 = vpop.f32.mrf.mxu1  ;;  %1551 = vmatprep.mubr.msk.f32.mxu1 %vm1640_vm2, %v2525_v0 }
 0x1eb   :  { %v730_v8 = vmax.f32 %v659_v57, 0.0 }
 0x1ec   :  { %v663_v13 = vpop.f32.mrf.mxu1 }
 0x1ed   :  { %v664_v16 = vadd.f32 %v2148_v44, %v663_v13  ;;  %1552 = vmatmul.mubr.f32.gmra.mxu1 %v730_v8 }
 0x1ee   :  { %v1449_v20 = vpop.f32.mrf.mxu1  ;;  %1554 = vmatprep.mubr.msk.f32.mxu1 %vm1640_vm2, %v2525_v0 }
 0x1ef   :  { %v731_v10 = vmax.f32 %v664_v16, 0.0 }
 0x1f0   :  { %v668_v22 = vpop.f32.mrf.mxu1 }
 0x1f1   :  { %v669_v25 = vadd.f32 %v2148_v44, %v668_v22  ;;  %1555 = vmatmul.mubr.f32.gmra.mxu1 %v731_v10 }
 0x1f2   :  { %v1452_v29 = vpop.f32.mrf.mxu1  ;;  %1557 = vmatprep.mubr.msk.f32.mxu1 %vm1640_vm2, %v2525_v0 }
 0x1f3   :  { %v732_v33 = vmax.f32 %v669_v25, 0.0 }
 0x1f4   :  { %v673_v40 = vpop.f32.mrf.mxu1 }
 0x1f5   :  { %v674_v49 = vadd.f32 %v2148_v44, %v673_v40  ;;  %1558 = vmatmul.mubr.f32.gmra.mxu1 %v732_v33 }
 0x1f6   :  { %v1455_v57 = vpop.f32.mrf.mxu1  ;;  %1560 = vmatprep.mubr.msk.f32.mxu1 %vm1640_vm2, %v2525_v0 }
 0x1f7   :  { %v733_v62 = vmax.f32 %v674_v49, 0.0 }
 0x1f8   :  { %v678_v8 = vpop.f32.mrf.mxu1 }
 0x1f9   :  { %v679_v13 = vadd.f32 %v2148_v44, %v678_v8  ;;  %1561 = vmatmul.mubr.f32.gmra.mxu1 %v733_v62 }
 0x1fa   :  { %v1458_v16 = vpop.f32.mrf.mxu1  ;;  %1563 = vmatprep.mubr.msk.f32.mxu1 %vm1640_vm2, %v2525_v0 }
 0x1fb   :  { %v734_v20 = vmax.f32 %v679_v13, 0.0 }
 0x1fc   :  { %v683_v10 = vpop.f32.mrf.mxu1 }
 0x1fd   :  { %v684_v22 = vadd.f32 %v2148_v44, %v683_v10  ;;  %1564 = vmatmul.mubr.f32.gmra.mxu1 %v734_v20 }
 0x1fe   :  { %v1461_v25 = vpop.f32.mrf.mxu1  ;;  %1566 = vmatprep.mubr.msk.f32.mxu1 %vm1640_vm2, %v2525_v0 }
 0x1ff   :  { %v735_v29 = vmax.f32 %v684_v22, 0.0 }
 0x200   :  { %v688_v33 = vpop.f32.mrf.mxu1 }
 0x201   :  { %v689_v40 = vadd.f32 %v2148_v44, %v688_v33  ;;  %1567 = vmatmul.mubr.f32.gmra.mxu1 %v735_v29 }
 0x202   :  { %v1464_v49 = vpop.f32.mrf.mxu1  ;;  %1569 = vmatprep.mubr.msk.f32.mxu1 %vm1640_vm2, %v2525_v0 }
 0x203   :  { %v736_v57 = vmax.f32 %v689_v40, 0.0 }
 0x204   :  { %v693_v62 = vpop.f32.mrf.mxu1 }
 0x205   :  { %v694_v8 = vadd.f32 %v2148_v44, %v693_v62  ;;  %1570 = vmatmul.mubr.f32.gmra.mxu1 %v736_v57 }
 0x206   :  { %v1467_v13 = vpop.f32.mrf.mxu1  ;;  %1572 = vmatprep.mubr.msk.f32.mxu1 %vm1640_vm2, %v2525_v0 }
 0x207   :  { %v737_v16 = vmax.f32 %v694_v8, 0.0 }
 0x208   :  { %v698_v20 = vpop.f32.mrf.mxu1 }
 0x209   :  { %v699_v10 = vadd.f32 %v2148_v44, %v698_v20  ;;  %1573 = vmatmul.mubr.f32.gmra.mxu1 %v737_v16 }
 0x20a   :  { %v1470_v22 = vpop.f32.mrf.mxu1  ;;  %1575 = vmatprep.mubr.msk.f32.mxu1 %vm1640_vm2, %v2525_v0 }
 0x20b   :  { %v738_v25 = vmax.f32 %v699_v10, 0.0 }
 0x20c   :  { %v703_v29 = vpop.f32.mrf.mxu1 }
 0x20d   :  { %v704_v33 = vadd.f32 %v2148_v44, %v703_v29  ;;  %1576 = vmatmul.mubr.f32.gmra.mxu1 %v738_v25 }
 0x20e   :  { %v1473_v40 = vpop.f32.mrf.mxu1  ;;  %1578 = vmatprep.mubr.msk.f32.mxu1 %vm1640_vm2, %v2525_v0 }
 0x20f   :  { %v739_v49 = vmax.f32 %v704_v33, 0.0 }
 0x210   :  { %v708_v57 = vpop.f32.mrf.mxu1 }
 0x211   :  { %v709_v62 = vadd.f32 %v2148_v44, %v708_v57  ;;  %1579 = vmatmul.mubr.f32.gmra.mxu1 %v739_v49 }
 0x212   :  { %v1476_v8 = vpop.f32.mrf.mxu1  ;;  %1581 = vmatprep.mubr.msk.f32.mxu1 %vm1640_vm2, %v2525_v0 }
 0x213   :  { %v740_v13 = vmax.f32 %v709_v62, 0.0 }
 0x214   :  { %v713_v16 = vpop.f32.mrf.mxu1 }
 0x215   :  { %v714_v20 = vadd.f32 %v2148_v44, %v713_v16  ;;  %1582 = vmatmul.mubr.f32.gmra.mxu1 %v740_v13 }
 0x216   :  { %1584 = vmatprep.mubr.msk.f32.mxu1 %vm1640_vm2, %v2525_v0  ;;  %v1479_v10 = vpop.f32.mrf.mxu1 }
 0x217   :  { %v741_v22 = vmax.f32 %v714_v20, 0.0 }
 0x219   :  { %1585 = vmatmul.mubr.f32.gmra.mxu1 %v741_v22 }
 0x21a   :  { %1247 = vmatprep.mubr.msk.f32.mxu1 %vm173_vm0, %v1955_v11 }
 0x279   :  { %v2225_v25 = vpop.f32.mrf.mxu1 }
 0x27b   :  { %v1514_v29 = vpop.f32.mrf.mxu1 }
 0x27d   :  { %v2227_v33 = vpop.f32.mrf.mxu1 }
 0x27f   :  { %v1517_v40 = vpop.f32.mrf.mxu1 }
 0x281   :  { %v2229_v49 = vpop.f32.mrf.mxu1 }
 0x283   :  { %v1520_v57 = vpop.f32.mrf.mxu1 }
 0x285   :  { %v2231_v44 = vpop.f32.mrf.mxu1 }
 0x287   :  { %v1523_v62 = vpop.f32.mrf.mxu1 }
 0x289   :  { %v2233_v8 = vpop.f32.mrf.mxu1 }
 0x28b   :  { %v1526_v13 = vpop.f32.mrf.mxu1 }
 0x28d   :  { %v2235_v16 = vpop.f32.mrf.mxu1 }
 0x28f   :  { %v1529_v20 = vpop.f32.mrf.mxu1 }
 0x291   :  { %v2237_v10 = vpop.f32.mrf.mxu1 }
 0x293   :  { %v1532_v11 = vpop.f32.mrf.mxu1 }
 0x295   :  { %v859_v22 = vpop.f32.mrf.mxu1 }
 0x297   :  { %v1535_v29 = vpop.f32.mrf.mxu1 }
 0x299   :  { %v864_v0 = vpop.f32.mrf.mxu1 }
 0x29b   :  { %v1538_v6 = vpop.f32.mrf.mxu1 }
 0x29d   :  { %v869_v40 = vpop.f32.mrf.mxu1 }
 0x29f   :  { %v1541_v1 = vpop.f32.mrf.mxu1 }
 0x2a1   :  { %v874_v60 = vpop.f32.mrf.mxu1 }
 0x2a3   :  { %v1544_v57 = vpop.f32.mrf.mxu1 }
 0x2a5   :  { %v879_v55 = vpop.f32.mrf.mxu1 }
 0x2a7   :  { %v1547_v51 = vpop.f32.mrf.mxu1 }
 0x2a9   :  { %v884_v62 = vpop.f32.mrf.mxu1 }
 0x2ab   :  { %v1550_v46 = vpop.f32.mrf.mxu1 }
 0x2ad   :  { %v889_v42 = vpop.f32.mrf.mxu1 }
 0x2af   :  { %v1553_v13 = vpop.f32.mrf.mxu1 }
 0x2b1   :  { %v894_v39 = vpop.f32.mrf.mxu1 }
 0x2b3   :  { %v1556_v35 = vpop.f32.mrf.mxu1 }
 0x2b5   :  { %v899_v20 = vpop.f32.mrf.mxu1 }
 0x2b6   :  { %956 = vmatpush1.msra.mxu0 %v899_v20  ;;  %1612 = vmatpush1.msra.mxu1 %v899_v20 }
 0x2b7   :  { %v1559_v11 = vpop.f32.mrf.mxu1  ;;  %957 = vmatprep.subr.mxu0 %v2547_v30  ;;  %1588 = vmatprep.subr.mxu1 %v2547_v30 }
 0x2b8   :  { %958 = vmatpush1.msra.mxu0 %v894_v39  ;;  %1613 = vmatpush1.msra.mxu1 %v894_v39 }
 0x2b9   :  { %v2241_v1 = vpop.f32.mrf.mxu1  ;;  %959 = vmatprep.subr.mxu0 %v2547_v30  ;;  %1589 = vmatprep.subr.mxu1 %v2547_v30 }
 0x2ba   :  { %960 = vmatpush1.msra.mxu0 %v889_v42  ;;  %1614 = vmatpush1.msra.mxu1 %v889_v42 }
 0x2bb   :  { %v1562_v46 = vpop.f32.mrf.mxu1  ;;  %961 = vmatprep.subr.mxu0 %v2547_v30  ;;  %1590 = vmatprep.subr.mxu1 %v2547_v30 }
 0x2bc   :  { %962 = vmatpush1.msra.mxu0 %v884_v62  ;;  %1615 = vmatpush1.msra.mxu1 %v884_v62 }
 0x2bd   :  { %v2247_v35 = vpop.f32.mrf.mxu1  ;;  %963 = vmatprep.subr.mxu0 %v2547_v30  ;;  %1591 = vmatprep.subr.mxu1 %v2547_v30 }
 0x2be   :  { %964 = vmatpush1.msra.mxu0 %v879_v55  ;;  %1616 = vmatpush1.msra.mxu1 %v879_v55 }
 0x2bf   :  { %v1565_v39 = vpop.f32.mrf.mxu1  ;;  %965 = vmatprep.subr.mxu0 %v2547_v30  ;;  %1592 = vmatprep.subr.mxu1 %v2547_v30 }
 0x2c0   :  { %966 = vmatpush1.msra.mxu0 %v874_v60  ;;  %1617 = vmatpush1.msra.mxu1 %v874_v60 }
 0x2c1   :  { %v2253_v42 = vpop.f32.mrf.mxu1  ;;  %967 = vmatprep.subr.mxu0 %v2547_v30  ;;  %1593 = vmatprep.subr.mxu1 %v2547_v30 }
 0x2c2   :  { %968 = vmatpush1.msra.mxu0 %v869_v40  ;;  %1618 = vmatpush1.msra.mxu1 %v869_v40 }
 0x2c3   :  { %v1568_v51 = vpop.f32.mrf.mxu1  ;;  %969 = vmatprep.subr.mxu0 %v2547_v30  ;;  %1594 = vmatprep.subr.mxu1 %v2547_v30 }
 0x2c4   :  { %970 = vmatpush1.msra.mxu0 %v864_v0  ;;  %1619 = vmatpush1.msra.mxu1 %v864_v0 }
 0x2c5   :  { %v2259_v55 = vpop.f32.mrf.mxu1  ;;  %971 = vmatprep.subr.mxu0 %v2547_v30  ;;  %1595 = vmatprep.subr.mxu1 %v2547_v30 }
 0x2c6   :  { %972 = vmatpush1.msra.mxu0 %v859_v22  ;;  %1620 = vmatpush1.msra.mxu1 %v859_v22 }
 0x2c7   :  { %v1571_v60 = vpop.f32.mrf.mxu1  ;;  %973 = vmatprep.subr.mxu0 %v2547_v30  ;;  %1596 = vmatprep.subr.mxu1 %v2547_v30 }
 0x2c8   :  { %974 = vmatpush1.msra.mxu0 %v2237_v10  ;;  %1621 = vmatpush1.msra.mxu1 %v2237_v10 }
 0x2c9   :  { %v924_v6 = vpop.f32.mrf.mxu1  ;;  %975 = vmatprep.subr.mxu0 %v2547_v30  ;;  %1597 = vmatprep.subr.mxu1 %v2547_v30 }
 0x2ca   :  { %976 = vmatpush1.msra.mxu0 %v2235_v16  ;;  %1622 = vmatpush1.msra.mxu1 %v2235_v16 }
 0x2cb   :  { %v1574_v0 = vpop.f32.mrf.mxu1  ;;  %977 = vmatprep.subr.mxu0 %v2547_v30  ;;  %1598 = vmatprep.subr.mxu1 %v2547_v30 }
 0x2cc   :  { %978 = vmatpush1.msra.mxu0 %v2233_v8  ;;  %1623 = vmatpush1.msra.mxu1 %v2233_v8 }
 0x2cd   :  { %v929_v22 = vpop.f32.mrf.mxu1  ;;  %979 = vmatprep.subr.mxu0 %v2547_v30  ;;  %1599 = vmatprep.subr.mxu1 %v2547_v30 }
 0x2ce   :  { %980 = vmatpush1.msra.mxu0 %v2231_v44  ;;  %1624 = vmatpush1.msra.mxu1 %v2231_v44 }
 0x2cf   :  { %v1577_v10 = vpop.f32.mrf.mxu1  ;;  %981 = vmatprep.subr.mxu0 %v2547_v30  ;;  %1600 = vmatprep.subr.mxu1 %v2547_v30 }
 0x2d0   :  { %982 = vmatpush1.msra.mxu0 %v2229_v49  ;;  %1625 = vmatpush1.msra.mxu1 %v2229_v49 }
 0x2d1   :  { %v934_v16 = vpop.f32.mrf.mxu1  ;;  %983 = vmatprep.subr.mxu0 %v2547_v30  ;;  %1601 = vmatprep.subr.mxu1 %v2547_v30 }
 0x2d2   :  { %984 = vmatpush1.msra.mxu0 %v2227_v33  ;;  %1626 = vmatpush1.msra.mxu1 %v2227_v33 }
 0x2d3   :  { %v1580_v8 = vpop.f32.mrf.mxu1  ;;  %985 = vmatprep.subr.mxu0 %v2547_v30  ;;  %1602 = vmatprep.subr.mxu1 %v2547_v30 }
 0x2d4   :  { %986 = vmatpush1.msra.mxu0 %v2225_v25  ;;  %1627 = vmatpush1.msra.mxu1 %v2225_v25 }
 0x2d5   :  { %v939_v44 = vpop.f32.mrf.mxu1  ;;  %1001 = vmatprep.subr.mxu0 %v2547_v30  ;;  %1603 = vmatprep.subr.mxu1 %v2547_v30 }
 0x2d7   :  { %v1583_v49 = vpop.f32.mrf.mxu1 }
 0x2d9   :  { %v944_v29 = vpop.f32.mrf.mxu1 }
 0x2da   :  { %1002 = vmatpush2.msra.mxu0 %v944_v29  ;;  %1628 = vmatpush2.msra.mxu1 %v944_v29 }
 0x2db   :  { %1003 = vmatprep.subr.mxu0 %v2547_v30  ;;  %1604 = vmatprep.subr.mxu1 %v2547_v30  ;;  %v1586_v33 = vpop.f32.mrf.mxu1 }
 0x2dc   :  { %1004 = vmatpush2.msra.mxu0 %v939_v44  ;;  %1629 = vmatpush2.msra.mxu1 %v939_v44 }
 0x2dd   :  { %1005 = vmatprep.subr.mxu0 %v2547_v30  ;;  %1605 = vmatprep.subr.mxu1 %v2547_v30 }
 0x2de   :  { %1006 = vmatpush2.msra.mxu0 %v934_v16  ;;  %1630 = vmatpush2.msra.mxu1 %v934_v16 }
 0x2df   :  { %1007 = vmatprep.subr.mxu0 %v2547_v30  ;;  %1606 = vmatprep.subr.mxu1 %v2547_v30 }
 0x2e0   :  { %1008 = vmatpush2.msra.mxu0 %v929_v22  ;;  %1631 = vmatpush2.msra.mxu1 %v929_v22 }
 0x2e1   :  { %1009 = vmatprep.subr.mxu0 %v2547_v30  ;;  %1607 = vmatprep.subr.mxu1 %v2547_v30 }
 0x2e2   :  { %1010 = vmatpush2.msra.mxu0 %v924_v6  ;;  %1632 = vmatpush2.msra.mxu1 %v924_v6 }
 0x2e3   :  { %1011 = vmatprep.subr.mxu0 %v2547_v30  ;;  %1608 = vmatprep.subr.mxu1 %v2547_v30 }
 0x2e4   :  { %1012 = vmatpush2.msra.mxu0 %v2259_v55  ;;  %1633 = vmatpush2.msra.mxu1 %v2259_v55 }
 0x2e5   :  { %1013 = vmatprep.subr.mxu0 %v2547_v30  ;;  %1609 = vmatprep.subr.mxu1 %v2547_v30 }
 0x2e6   :  { %1014 = vmatpush2.msra.mxu0 %v2253_v42  ;;  %1634 = vmatpush2.msra.mxu1 %v2253_v42 }
 0x2e7   :  { %1015 = vmatprep.subr.mxu0 %v2547_v30  ;;  %1610 = vmatprep.subr.mxu1 %v2547_v30 }
 0x2e8   :  { %1016 = vmatpush2.msra.mxu0 %v2247_v35  ;;  %1635 = vmatpush2.msra.mxu1 %v2247_v35 }
 0x2e9   :  { %1017 = vmatprep.subr.mxu0 %v2547_v30  ;;  %1611 = vmatprep.subr.mxu1 %v2547_v30 }
 0x2ea   :  { %1018 = vmatpush2.msra.mxu0 %v2241_v1  ;;  %1636 = vmatpush2.msra.mxu1 %v2241_v1 }
 0x2eb   :  { %1020 = vmatmul.mubr.f32.vlgmr.msra.gmra.mxu0 %v1791_v32  ;;  %1115 = vmatmul.mubr.f32.vlgmr.msra.gmra.mxu1 %v1958_v14  ;;  %v2548_v32 = vld [vmem:[#allocation2_spill] sm:$0xff] }
 0x2ec   :  { %1229 = vmatprep.mubr.msk.f32.mxu0 %vm173_vm0, %v1794_v34  ;;  %1248 = vmatprep.mubr.msk.f32.mxu1 %vm173_vm0, %v1962_v18  ;;  %v2549_v34 = vld [vmem:[#allocation3_spill] sm:$0xff] }
 0x2ef   :  { %1025 = vmatmul.mubr.f32.gmra.mxu0 %v1798_v36  ;;  %1120 = vmatmul.mubr.f32.gmra.mxu1 %v1968_v23  ;;  %v2550_v36 = vld [vmem:[#allocation4_spill] sm:$0xff] }
 0x2f0   :  { %1230 = vmatprep.mubr.msk.f32.mxu0 %vm173_vm0, %v1803_v38  ;;  %1249 = vmatprep.mubr.msk.f32.mxu1 %vm173_vm0, %v1972_v27  ;;  %v2551_v38 = vld [vmem:[#allocation5_spill] sm:$0xff] }
 0x2f3   :  { %1030 = vmatmul.mubr.f32.gmra.mxu0 %v1809_v41  ;;  %1125 = vmatmul.mubr.f32.gmra.mxu1 %v1975_v31  ;;  %v2552_v41 = vld [vmem:[#allocation6_spill] sm:$0xff] }
 0x2f4   :  { %1231 = vmatprep.mubr.msk.f32.mxu0 %vm173_vm0, %v1813_v43  ;;  %1250 = vmatprep.mubr.msk.f32.mxu1 %vm173_vm0, %v1979_v37  ;;  %v2553_v43 = vld [vmem:[#allocation7_spill] sm:$0xff] }
 0x2f7   :  { %1035 = vmatmul.mubr.f32.gmra.mxu0 %v1816_v45  ;;  %1130 = vmatmul.mubr.f32.gmra.mxu1 %v1985_v48  ;;  %v2554_v45 = vld [vmem:[#allocation8_spill] sm:$0xff] }
 0x2f8   :  { %1232 = vmatprep.mubr.msk.f32.mxu0 %vm173_vm0, %v1820_v47  ;;  %1251 = vmatprep.mubr.msk.f32.mxu1 %vm173_vm0, %v1989_v53  ;;  %v2555_v47 = vld [vmem:[#allocation9_spill] sm:$0xff] }
 0x2fb   :  { %1040 = vmatmul.mubr.f32.gmra.mxu0 %v1826_v50  ;;  %1135 = vmatmul.mubr.f32.gmra.mxu1 %v1992_v58  ;;  %v2556_v50 = vld [vmem:[#allocation10_spill] sm:$0xff] }
 0x2fc   :  { %1233 = vmatprep.mubr.msk.f32.mxu0 %vm173_vm0, %v1830_v52  ;;  %1252 = vmatprep.mubr.msk.f32.mxu1 %vm173_vm0, %v1996_v3  ;;  %v2557_v52 = vld [vmem:[#allocation11_spill] sm:$0xff] }
 0x2ff   :  { %1045 = vmatmul.mubr.f32.gmra.mxu0 %v1833_v54  ;;  %1140 = vmatmul.mubr.f32.gmra.mxu1 %v1999_v4  ;;  %v2391_v54 = vld [vmem:[%s2523_s5] ss:$0 sm:$0xff] }
 0x300   :  { %1234 = vmatprep.mubr.msk.f32.mxu0 %vm173_vm0, %v1837_v56 }
 0x303   :  { %1050 = vmatmul.mubr.f32.gmra.mxu0 %v1843_v59 }
 0x304   :  { %1235 = vmatprep.mubr.msk.f32.mxu0 %vm173_vm0, %v1847_v61 }
 0x307   :  { %1055 = vmatmul.mubr.f32.gmra.mxu0 %v1850_v63 }
 0x308   :  { %1236 = vmatprep.mubr.msk.f32.mxu0 %vm173_vm0, %v1854_v2 }
 0x30b   :  { %1060 = vmatmul.mubr.f32.gmra.mxu0 %v1860_v5 }
 0x30c   :  { %1237 = vmatprep.mubr.msk.f32.mxu0 %vm173_vm0, %v1864_v7 }
 0x30f   :  { %1065 = vmatmul.mubr.f32.gmra.mxu0 %v1867_v9 }
 0x310   :  { %1238 = vmatprep.mubr.msk.f32.mxu0 %vm173_vm0, %v1871_v12 }
 0x313   :  { %1070 = vmatmul.mubr.f32.gmra.mxu0 %v1877_v15 }
 0x314   :  { %1239 = vmatprep.mubr.msk.f32.mxu0 %vm173_vm0, %v1881_v17 }
 0x317   :  { %1075 = vmatmul.mubr.f32.gmra.mxu0 %v1884_v19 }
 0x318   :  { %1240 = vmatprep.mubr.msk.f32.mxu0 %vm173_vm0, %v1888_v21 }
 0x31b   :  { %1080 = vmatmul.mubr.f32.gmra.mxu0 %v1894_v24 }
 0x31c   :  { %1241 = vmatprep.mubr.msk.f32.mxu0 %vm173_vm0, %v1898_v26 }
 0x31f   :  { %1085 = vmatmul.mubr.f32.gmra.mxu0 %v1901_v28 }
 0x320   :  { %1242 = vmatprep.mubr.msk.f32.mxu0 %vm173_vm0, %v2548_v32 }
 0x323   :  { %1090 = vmatmul.mubr.f32.gmra.mxu0 %v2549_v34 }
 0x324   :  { %1243 = vmatprep.mubr.msk.f32.mxu0 %vm173_vm0, %v2550_v36 }
 0x327   :  { %1095 = vmatmul.mubr.f32.gmra.mxu0 %v2551_v38 }
 0x328   :  { %1244 = vmatprep.mubr.msk.f32.mxu0 %vm173_vm0, %v2552_v41 }
 0x32b   :  { %1100 = vmatmul.mubr.f32.gmra.mxu0 %v2553_v43 }
 0x32c   :  { %1245 = vmatprep.mubr.msk.f32.mxu0 %vm173_vm0, %v2554_v45 }
 0x32f   :  { %1105 = vmatmul.mubr.f32.gmra.mxu0 %v2555_v47 }
 0x330   :  { %1246 = vmatprep.mubr.msk.f32.mxu0 %vm173_vm0, %v2556_v50 }
 0x333   :  { %1110 = vmatmul.mubr.f32.gmra.mxu0 %v2557_v52 }
 0x3ab   :  { %v1021_v56 = vpop.f32.mrf.mxu0  ;;  %v1116_v59 = vpop.f32.mrf.mxu1 }
 0x3ac   :  { %v1022_v61 = vadd.f32 %v2391_v54, %v1021_v56  ;;  %v1117_v63 = vadd.f32 %v2391_v54, %v1116_v59 }
 0x3ad   :  { %v1023_v2 = vpop.f32.mrf.mxu0  ;;  %v1118_v5 = vpop.f32.mrf.mxu1 }
 0x3ae   :  { %1146 = vst.msk [vmem:[%s2524_s6] sm:$0xff] %vm1145_vm4, %v1022_v61  ;;  %1165 = vst.msk [vmem:[%s2524_s6 + $0x98] sm:$0xff] %vm1145_vm4, %v1117_v63 }
 0x3af   :  { %v1026_v7 = vpop.f32.mrf.mxu0  ;;  %v1121_v9 = vpop.f32.mrf.mxu1 }
 0x3b0   :  { %v1027_v12 = vadd.f32 %v2391_v54, %v1026_v7  ;;  %v1122_v15 = vadd.f32 %v2391_v54, %v1121_v9 }
 0x3b1   :  { %v1028_v17 = vpop.f32.mrf.mxu0  ;;  %v1123_v19 = vpop.f32.mrf.mxu1 }
 0x3b2   :  { %1147 = vst.msk [vmem:[%s2524_s6 + $0x8] sm:$0xff] %vm1145_vm4, %v1027_v12  ;;  %1166 = vst.msk [vmem:[%s2524_s6 + $0xa0] sm:$0xff] %vm1145_vm4, %v1122_v15 }
 0x3b3   :  { %v1031_v21 = vpop.f32.mrf.mxu0  ;;  %v1126_v24 = vpop.f32.mrf.mxu1 }
 0x3b4   :  { %v1032_v26 = vadd.f32 %v2391_v54, %v1031_v21  ;;  %v1127_v28 = vadd.f32 %v2391_v54, %v1126_v24 }
 0x3b5   :  { %v1033_v30 = vpop.f32.mrf.mxu0  ;;  %v1128_v14 = vpop.f32.mrf.mxu1 }
 0x3b6   :  { %1148 = vst.msk [vmem:[%s2524_s6 + $0x10] sm:$0xff] %vm1145_vm4, %v1032_v26  ;;  %1167 = vst.msk [vmem:[%s2524_s6 + $0xa8] sm:$0xff] %vm1145_vm4, %v1127_v28 }
 0x3b7   :  { %v1036_v18 = vpop.f32.mrf.mxu0  ;;  %v1131_v23 = vpop.f32.mrf.mxu1 }
 0x3b8   :  { %v1037_v27 = vadd.f32 %v2391_v54, %v1036_v18  ;;  %v1132_v31 = vadd.f32 %v2391_v54, %v1131_v23 }
 0x3b9   :  { %v1038_v37 = vpop.f32.mrf.mxu0  ;;  %v1133_v48 = vpop.f32.mrf.mxu1 }
 0x3ba   :  { %1149 = vst.msk [vmem:[%s2524_s6 + $0x18] sm:$0xff] %vm1145_vm4, %v1037_v27  ;;  %1168 = vst.msk [vmem:[%s2524_s6 + $0xb0] sm:$0xff] %vm1145_vm4, %v1132_v31 }
 0x3bb   :  { %v1041_v53 = vpop.f32.mrf.mxu0  ;;  %v1136_v58 = vpop.f32.mrf.mxu1 }
 0x3bc   :  { %v1042_v3 = vadd.f32 %v2391_v54, %v1041_v53  ;;  %v1137_v4 = vadd.f32 %v2391_v54, %v1136_v58 }
 0x3bd   :  { %v1043_v25 = vpop.f32.mrf.mxu0  ;;  %v1138_v40 = vpop.f32.mrf.mxu1 }
 0x3be   :  { %1150 = vst.msk [vmem:[%s2524_s6 + $0x20] sm:$0xff] %vm1145_vm4, %v1042_v3  ;;  %1169 = vst.msk [vmem:[%s2524_s6 + $0xb8] sm:$0xff] %vm1145_vm4, %v1137_v4 }
 0x3bf   :  { %v1046_v57 = vpop.f32.mrf.mxu0  ;;  %v1141_v62 = vpop.f32.mrf.mxu1 }
 0x3c0   :  { %v1047_v13 = vadd.f32 %v2391_v54, %v1046_v57  ;;  %v1142_v20 = vadd.f32 %v2391_v54, %v1141_v62 }
 0x3c1   :  { %v1048_v11 = vpop.f32.mrf.mxu0  ;;  %v1143_v1 = vpop.f32.mrf.mxu1 }
 0x3c2   :  { %1151 = vst.msk [vmem:[%s2524_s6 + $0x28] sm:$0xff] %vm1145_vm4, %v1047_v13  ;;  %1170 = vst.msk [vmem:[%s2524_s6 + $0xc0] sm:$0xff] %vm1145_vm4, %v1142_v20 }
 0x3c3   :  { %v1051_v46 = vpop.f32.mrf.mxu0 }
 0x3c4   :  { %v1052_v35 = vadd.f32 %v2391_v54, %v1051_v46 }
 0x3c5   :  { %v1053_v39 = vpop.f32.mrf.mxu0 }
 0x3c6   :  { %1152 = vst.msk [vmem:[%s2524_s6 + $0x30] sm:$0xff] %vm1145_vm4, %v1052_v35 }
 0x3c7   :  { %v1056_v42 = vpop.f32.mrf.mxu0 }
 0x3c8   :  { %v1057_v51 = vadd.f32 %v2391_v54, %v1056_v42 }
 0x3c9   :  { %v1058_v55 = vpop.f32.mrf.mxu0 }
 0x3ca   :  { %1153 = vst.msk [vmem:[%s2524_s6 + $0x38] sm:$0xff] %vm1145_vm4, %v1057_v51 }
 0x3cb   :  { %v1061_v60 = vpop.f32.mrf.mxu0 }
 0x3cc   :  { %v1062_v6 = vadd.f32 %v2391_v54, %v1061_v60 }
 0x3cd   :  { %v1063_v0 = vpop.f32.mrf.mxu0 }
 0x3ce   :  { %1154 = vst.msk [vmem:[%s2524_s6 + $0x40] sm:$0xff] %vm1145_vm4, %v1062_v6 }
 0x3cf   :  { %v1066_v22 = vpop.f32.mrf.mxu0 }
 0x3d0   :  { %v1067_v10 = vadd.f32 %v2391_v54, %v1066_v22 }
 0x3d1   :  { %v1068_v16 = vpop.f32.mrf.mxu0 }
 0x3d2   :  { %1155 = vst.msk [vmem:[%s2524_s6 + $0x48] sm:$0xff] %vm1145_vm4, %v1067_v10 }
 0x3d3   :  { %v1071_v8 = vpop.f32.mrf.mxu0 }
 0x3d4   :  { %v1072_v44 = vadd.f32 %v2391_v54, %v1071_v8 }
 0x3d5   :  { %v1073_v49 = vpop.f32.mrf.mxu0 }
 0x3d6   :  { %1156 = vst.msk [vmem:[%s2524_s6 + $0x50] sm:$0xff] %vm1145_vm4, %v1072_v44 }
 0x3d7   :  { %v1076_v29 = vpop.f32.mrf.mxu0 }
 0x3d8   :  { %v1077_v33 = vadd.f32 %v2391_v54, %v1076_v29 }
 0x3d9   :  { %v1078_v32 = vpop.f32.mrf.mxu0 }
 0x3da   :  { %1157 = vst.msk [vmem:[%s2524_s6 + $0x58] sm:$0xff] %vm1145_vm4, %v1077_v33 }
 0x3db   :  { %v1081_v34 = vpop.f32.mrf.mxu0 }
 0x3dc   :  { %v1082_v36 = vadd.f32 %v2391_v54, %v1081_v34 }
 0x3dd   :  { %v1083_v38 = vpop.f32.mrf.mxu0 }
 0x3de   :  { %1158 = vst.msk [vmem:[%s2524_s6 + $0x60] sm:$0xff] %vm1145_vm4, %v1082_v36 }
 0x3df   :  { %v1086_v41 = vpop.f32.mrf.mxu0 }
 0x3e0   :  { %v1087_v43 = vadd.f32 %v2391_v54, %v1086_v41 }
 0x3e1   :  { %v1088_v45 = vpop.f32.mrf.mxu0 }
 0x3e2   :  { %1159 = vst.msk [vmem:[%s2524_s6 + $0x68] sm:$0xff] %vm1145_vm4, %v1087_v43 }
 0x3e3   :  { %v1091_v47 = vpop.f32.mrf.mxu0 }
 0x3e4   :  { %v1092_v50 = vadd.f32 %v2391_v54, %v1091_v47 }
 0x3e5   :  { %v1093_v52 = vpop.f32.mrf.mxu0 }
 0x3e6   :  { %1160 = vst.msk [vmem:[%s2524_s6 + $0x70] sm:$0xff] %vm1145_vm4, %v1092_v50 }
 0x3e7   :  { %v1096_v56 = vpop.f32.mrf.mxu0 }
 0x3e8   :  { %v1097_v59 = vadd.f32 %v2391_v54, %v1096_v56 }
 0x3e9   :  { %v1098_v61 = vpop.f32.mrf.mxu0 }
 0x3ea   :  { %1161 = vst.msk [vmem:[%s2524_s6 + $0x78] sm:$0xff] %vm1145_vm4, %v1097_v59 }
 0x3eb   :  { %v1101_v63 = vpop.f32.mrf.mxu0 }
 0x3ec   :  { %v1102_v2 = vadd.f32 %v2391_v54, %v1101_v63 }
 0x3ed   :  { %v1103_v5 = vpop.f32.mrf.mxu0 }
 0x3ee   :  { %1162 = vst.msk [vmem:[%s2524_s6 + $0x80] sm:$0xff] %vm1145_vm4, %v1102_v2 }
 0x3ef   :  { %v1106_v7 = vpop.f32.mrf.mxu0 }
 0x3f0   :  { %v1107_v9 = vadd.f32 %v2391_v54, %v1106_v7 }
 0x3f1   :  { %v1108_v12 = vpop.f32.mrf.mxu0 }
 0x3f2   :  { %1163 = vst.msk [vmem:[%s2524_s6 + $0x88] sm:$0xff] %vm1145_vm4, %v1107_v9 }
 0x3f3   :  { %v1111_v15 = vpop.f32.mrf.mxu0 }
 0x3f4   :  { %v1112_v17 = vadd.f32 %v2391_v54, %v1111_v15 }
 0x3f5   :  { %v1113_v19 = vpop.f32.mrf.mxu0 }
 0x3f6   :  { %1164 = vst.msk [vmem:[%s2524_s6 + $0x90] sm:$0xff] %vm1145_vm4, %v1112_v17 }

</bundles_post_ra>
